<compile_context>
chip_gen: v6e
topology: v6e:2x2x1
jax: 0.10.0
libtpu: 0.0.40
codegen_flags: <defaults>
</compile_context>

<pallas_src>
import jax
import jax.numpy as jnp
import numpy as np
from jax.experimental import pallas as pl
from jax.experimental.pallas import tpu as pltpu


# ----------------------------------------------------------------------------
# Fused kernel: entire Net forward for one image per grid step.
# ----------------------------------------------------------------------------

def net_kernel(x_ref, t1_ref, b1_ref, r1_ref, t2_ref, b2_ref, r2_ref,
               wf1_ref, bf1_ref, wf2_ref, bf2_ref, o_ref):
    f32 = jnp.float32
    x = x_ref[0]                                          # (28, 28)

    # conv1 as 5 width-Toeplitz matmuls.
    # acc1 rows = output height oh (24); cols = owp*120 + ow2*10 + co  (240).
    acc1 = jnp.dot(x[0:24, :], t1_ref[0], preferred_element_type=f32) + b1_ref[...]
    for ki in range(1, 5):
        acc1 = acc1 + jnp.dot(x[ki:ki + 24, :], t1_ref[ki],
                              preferred_element_type=f32)

    # 2x2 max-pool + relu.  Height pairs: even/odd row-selection matmuls.
    # Width pairs: parity-major column order -> two static column slices.
    rmax = jnp.maximum(jnp.dot(r1_ref[0], acc1, preferred_element_type=f32),
                       jnp.dot(r1_ref[1], acc1, preferred_element_type=f32))   # (12, 240)
    h1 = jnp.maximum(jnp.maximum(rmax[:, 0:120], rmax[:, 120:240]), 0.0)       # (12, 120)

    # conv2 (Dropout2d == identity in eval mode) as 5 width-Toeplitz matmuls.
    # TODO(synk): Dropout2d / F.dropout are eval-mode identity (no RNG in fwd).
    acc2 = jnp.dot(h1[0:8, :], t2_ref[0], preferred_element_type=f32) + b2_ref[...]
    for ki in range(1, 5):
        acc2 = acc2 + jnp.dot(h1[ki:ki + 8, :], t2_ref[ki],
                              preferred_element_type=f32)                      # (8, 160)

    rmax2 = jnp.maximum(jnp.dot(r2_ref[0], acc2, preferred_element_type=f32),
                        jnp.dot(r2_ref[1], acc2, preferred_element_type=f32))  # (4, 160)
    h2 = jnp.maximum(jnp.maximum(rmax2[:, 0:80], rmax2[:, 80:160]), 0.0)       # (4, 80)

    # fc1 + relu.  The x.view(-1, 320) flatten is folded into the row-block
    # structure of the pre-permuted fc1 weight (4 blocks of 80 rows).
    wf1 = wf1_ref[...]                                    # (320, 50)
    hfc = bf1_ref[...]                                    # (1, 50)
    for r in range(4):
        hfc = hfc + jnp.dot(h2[r:r + 1, :], wf1[r * 80:(r + 1) * 80, :],
                            preferred_element_type=f32)
    hfc = jnp.maximum(hfc, 0.0)

    # fc2 + log_softmax
    logits = jnp.dot(hfc, wf2_ref[...], preferred_element_type=f32) + bf2_ref[...]
    m = jnp.max(logits, axis=-1, keepdims=True)
    z = logits - m
    lse = jnp.log(jnp.sum(jnp.exp(z), axis=-1, keepdims=True))
    o_ref[...] = (z - lse).reshape(o_ref.shape)           # (1, 1, 10)


# ----------------------------------------------------------------------------
# One-time parameter preprocessing (hoisted out of the hot path).
# ----------------------------------------------------------------------------

def prepare_params(params):
    w_c1, b_c1, w_c2, b_c2, w_f1, b_f1, w_f2, b_f2 = [
        np.asarray(jax.device_get(p), dtype=np.float32) for p in params]

    # conv1 width-Toeplitz: (ki, iw, owp*120 + ow2*10 + co), ow = 2*ow2 + owp.
    w1 = w_c1.reshape(10, 5, 5)                           # (co, ki, kj)
    t1 = np.zeros((5, 28, 2, 12, 10), np.float32)
    for ki in range(5):
        for kj in range(5):
            for ow in range(24):
                t1[ki, ow + kj, ow % 2, ow // 2, :] = w1[:, ki, kj]
    t1 = t1.reshape(5, 28, 240)
    b1 = np.tile(b_c1, 24).reshape(1, 240)

    # conv2 width-Toeplitz: in cols = iw*10 + c ; out cols = owp*80 + ow2*20 + co.
    t2 = np.zeros((5, 12, 10, 2, 4, 20), np.float32)
    for ki in range(5):
        for kj in range(5):
            for ow in range(8):
                t2[ki, ow + kj, :, ow % 2, ow // 2, :] = w_c2[:, :, ki, kj].T
    t2 = t2.reshape(5, 120, 160)
    b2 = np.tile(b_c2, 8).reshape(1, 160)

    # even/odd row-selection matrices for the 2x2 max-pool height reduction.
    def row_sel(out_rows):
        sel = np.zeros((2, out_rows, 2 * out_rows), np.float32)
        for p in range(out_rows):
            sel[0, p, 2 * p] = 1.0
            sel[1, p, 2 * p + 1] = 1.0
        return sel

    r1 = row_sel(12)                                      # (2, 12, 24)
    r2 = row_sel(4)                                       # (2, 4, 8)

    # fc1 weight permuted from torch's NCHW flatten (c*16 + oh*4 + ow) to our
    # channel-last flatten (oh*80 + ow*20 + c), then transposed to (320, 50).
    wf1 = np.zeros((4, 80, 50), np.float32)
    for oh in range(4):
        for ow in range(4):
            for c in range(20):
                wf1[oh, ow * 20 + c, :] = w_f1[:, c * 16 + oh * 4 + ow]
    wf1 = wf1.reshape(320, 50)
    bf1 = b_f1.reshape(1, 50)

    wf2 = np.ascontiguousarray(w_f2.T)                    # (50, 10)
    bf2 = b_f2.reshape(1, 10)

    return tuple(jnp.asarray(a) for a in
                 (t1, b1, r1, t2, b2, r2, wf1, bf1, wf2, bf2))


# ----------------------------------------------------------------------------
# Forward pass: one fused pallas_call, grid = (batch,), batch axis parallel.
# ----------------------------------------------------------------------------

def net_forward(x, prepped):
    B = x.shape[0]
    x2 = x.reshape(B, 28, 28)
    t1, b1, r1, t2, b2, r2, wf1, bf1, wf2, bf2 = prepped

    out = pl.pallas_call(
        net_kernel,
        out_shape=jax.ShapeDtypeStruct((B, 1, 10), jnp.float32),
        grid=(B,),
        in_specs=[
            pl.BlockSpec((1, 28, 28), lambda i: (i, 0, 0)),       # image
            pl.BlockSpec((5, 28, 240), lambda i: (0, 0, 0)),      # conv1 Toeplitz
            pl.BlockSpec((1, 240), lambda i: (0, 0)),             # conv1 bias
            pl.BlockSpec((2, 12, 24), lambda i: (0, 0, 0)),       # pool1 row sel
            pl.BlockSpec((5, 120, 160), lambda i: (0, 0, 0)),     # conv2 Toeplitz
            pl.BlockSpec((1, 160), lambda i: (0, 0)),             # conv2 bias
            pl.BlockSpec((2, 4, 8), lambda i: (0, 0, 0)),         # pool2 row sel
            pl.BlockSpec((320, 50), lambda i: (0, 0)),            # fc1 weight
            pl.BlockSpec((1, 50), lambda i: (0, 0)),              # fc1 bias
            pl.BlockSpec((50, 10), lambda i: (0, 0)),             # fc2 weight
            pl.BlockSpec((1, 10), lambda i: (0, 0)),              # fc2 bias
        ],
        out_specs=pl.BlockSpec((1, 1, 10), lambda i: (i, 0, 0)),
        compiler_params=pltpu.CompilerParams(
            dimension_semantics=("parallel",)),
    )(x2, t1, b1, r1, t2, b2, r2, wf1, bf1, wf2, bf2)
    return out.reshape(B, 10)


# ----------------------------------------------------------------------------
# Pure-JAX reference (for an in-script correctness check).
# ----------------------------------------------------------------------------

def net_reference(x, params):
    w_c1, b_c1, w_c2, b_c2, w_f1, b_f1, w_f2, b_f2 = params
    dn = ("NCHW", "OIHW", "NCHW")
    hp = jax.lax.Precision.HIGHEST
    y = jax.lax.conv_general_dilated(x, w_c1, (1, 1), "VALID",
                                     dimension_numbers=dn, precision=hp)
    y = y + b_c1.reshape(1, 10, 1, 1)
    y = jax.lax.reduce_window(y, -jnp.inf, jax.lax.max,
                              (1, 1, 2, 2), (1, 1, 2, 2), "VALID")
    y = jnp.maximum(y, 0.0)
    y = jax.lax.conv_general_dilated(y, w_c2, (1, 1), "VALID",
                                     dimension_numbers=dn, precision=hp)
    y = y + b_c2.reshape(1, 20, 1, 1)
    y = jax.lax.reduce_window(y, -jnp.inf, jax.lax.max,
                              (1, 1, 2, 2), (1, 1, 2, 2), "VALID")
    y = jnp.maximum(y, 0.0)
    y = y.reshape(x.shape[0], 320)
    y = jnp.maximum(jnp.dot(y, w_f1.T, precision=hp) + b_f1, 0.0)
    y = jnp.dot(y, w_f2.T, precision=hp) + b_f2
    return jax.nn.log_softmax(y, axis=1)


# ----------------------------------------------------------------------------
# Deterministic parameter init (PyTorch-like uniform(+-1/sqrt(fan_in))).
# ----------------------------------------------------------------------------

def init_params(key):
    ks = jax.random.split(key, 8)

    def u(k, shape, fan_in):
        bound = 1.0 / np.sqrt(fan_in)
        return jax.random.uniform(k, shape, jnp.float32, -bound, bound)

    w_c1 = u(ks[0], (10, 1, 5, 5), 1 * 5 * 5)
    b_c1 = u(ks[1], (10,), 1 * 5 * 5)
    w_c2 = u(ks[2], (20, 10, 5, 5), 10 * 5 * 5)
    b_c2 = u(ks[3], (20,), 10 * 5 * 5)
    w_f1 = u(ks[4], (50, 320), 320)        # PyTorch Linear weight layout (out, in)
    b_f1 = u(ks[5], (50,), 320)
    w_f2 = u(ks[6], (10, 50), 50)
    b_f2 = u(ks[7], (10,), 50)
    return (w_c1, b_c1, w_c2, b_c2, w_f1, b_f1, w_f2, b_f2)


if __name__ == "__main__":
    root = jax.random.PRNGKey(0)
    k_params, k_x = jax.random.split(root)
    params = init_params(k_params)
    prepped = prepare_params(params)       # one-time weight preprocessing

    # MNIST-shaped input (28x28 single channel is required for the 320-d flatten).
    x = jax.random.normal(k_x, (2, 1, 28, 28), jnp.float32)

    fwd = jax.jit(net_forward)
    out = jax.block_until_ready(fwd(x, prepped))

    assert out.shape == (2, 10)
    assert out.dtype == jnp.float32

    # log_softmax sanity: exp(log_probs) sums to 1 per row
    sums = jnp.exp(out).sum(axis=1)
    assert bool(jnp.all(jnp.abs(sums - 1.0) < 1e-4))

    # numerical check against a pure-JAX reference of the same module
    ref = net_reference(x, params)
    assert bool(jnp.allclose(out, ref, atol=1e-2, rtol=1e-2))

    print("KERNEL_OK")
</pallas_src>

<mosaic_0001>
module attributes {stable_mosaic.version = 11 : i64} {
  func.func @net_kernel(%arg0: i32, %arg1: memref<1x28x28xf32, #tpu.memory_space<vmem>>, %arg2: memref<5x28x240xf32, #tpu.memory_space<vmem>>, %arg3: memref<1x240xf32, #tpu.memory_space<vmem>>, %arg4: memref<2x12x24xf32, #tpu.memory_space<vmem>>, %arg5: memref<5x120x160xf32, #tpu.memory_space<vmem>>, %arg6: memref<1x160xf32, #tpu.memory_space<vmem>>, %arg7: memref<2x4x8xf32, #tpu.memory_space<vmem>>, %arg8: memref<320x50xf32, #tpu.memory_space<vmem>>, %arg9: memref<1x50xf32, #tpu.memory_space<vmem>>, %arg10: memref<50x10xf32, #tpu.memory_space<vmem>>, %arg11: memref<1x10xf32, #tpu.memory_space<vmem>>, %arg12: memref<1x1x10xf32, #tpu.memory_space<vmem>>) attributes {dimension_semantics = [#tpu.dimension_semantics<parallel>], iteration_bounds = array<i64: 2>, scalar_prefetch = 0 : i64, scratch_operands = 0 : i64, tpu.core_type = #tpu.core_type<tc>, window_params = [{transform_indices = @transform_0, window_bounds = array<i64: 1, 28, 28>}, {pipeline_mode = #tpu.pipeline_mode<synchronous>, transform_indices = @transform_1, window_bounds = array<i64: 5, 28, 240>}, {pipeline_mode = #tpu.pipeline_mode<synchronous>, transform_indices = @transform_2, window_bounds = array<i64: 1, 240>}, {pipeline_mode = #tpu.pipeline_mode<synchronous>, transform_indices = @transform_3, window_bounds = array<i64: 2, 12, 24>}, {pipeline_mode = #tpu.pipeline_mode<synchronous>, transform_indices = @transform_4, window_bounds = array<i64: 5, 120, 160>}, {pipeline_mode = #tpu.pipeline_mode<synchronous>, transform_indices = @transform_5, window_bounds = array<i64: 1, 160>}, {pipeline_mode = #tpu.pipeline_mode<synchronous>, transform_indices = @transform_6, window_bounds = array<i64: 2, 4, 8>}, {pipeline_mode = #tpu.pipeline_mode<synchronous>, transform_indices = @transform_7, window_bounds = array<i64: 320, 50>}, {pipeline_mode = #tpu.pipeline_mode<synchronous>, transform_indices = @transform_8, window_bounds = array<i64: 1, 50>}, {pipeline_mode = #tpu.pipeline_mode<synchronous>, transform_indices = @transform_9, window_bounds = array<i64: 50, 10>}, {pipeline_mode = #tpu.pipeline_mode<synchronous>, transform_indices = @transform_10, window_bounds = array<i64: 1, 10>}, {transform_indices = @transform_11, window_bounds = array<i64: 1, 1, 10>}]} {
    %c0 = arith.constant 0 : index
    %c0_0 = arith.constant 0 : index
    %c0_1 = arith.constant 0 : index
    %0 = vector.load %arg1[%c0, %c0_0, %c0_1] : memref<1x28x28xf32, #tpu.memory_space<vmem>>, vector<1x28x28xf32>
    %1 = vector.shape_cast %0 : vector<1x28x28xf32> to vector<28x28xf32>
    %2 = vector.extract_strided_slice %1 {offsets = [0, 0], sizes = [24, 28], strides = [1, 1]} : vector<28x28xf32> to vector<24x28xf32>
    %c0_2 = arith.constant 0 : index
    %c0_3 = arith.constant 0 : index
    %c0_4 = arith.constant 0 : index
    %3 = vector.load %arg2[%c0_2, %c0_3, %c0_4] : memref<5x28x240xf32, #tpu.memory_space<vmem>>, vector<1x28x240xf32>
    %4 = vector.shape_cast %3 : vector<1x28x240xf32> to vector<28x240xf32>
    %cst = arith.constant dense<0.000000e+00> : vector<24x240xf32>
    %5 = tpu.matmul %2, %4, %cst {dimension_numbers = #tpu.dot_dimension_numbers<[1], [0], [0], [1], [0, 0, 1, 1], [], []>} : vector<24x28xf32>, vector<28x240xf32>, vector<24x240xf32> -> vector<24x240xf32>
    %c0_5 = arith.constant 0 : index
    %c0_6 = arith.constant 0 : index
    %6 = vector.load %arg3[%c0_5, %c0_6] : memref<1x240xf32, #tpu.memory_space<vmem>>, vector<1x240xf32>
    %7 = vector.broadcast %6 : vector<1x240xf32> to vector<24x240xf32>
    %8 = arith.addf %5, %7 : vector<24x240xf32>
    %9 = vector.extract_strided_slice %1 {offsets = [1, 0], sizes = [24, 28], strides = [1, 1]} : vector<28x28xf32> to vector<24x28xf32>
    %c1 = arith.constant 1 : index
    %c0_7 = arith.constant 0 : index
    %c0_8 = arith.constant 0 : index
    %10 = vector.load %arg2[%c1, %c0_7, %c0_8] : memref<5x28x240xf32, #tpu.memory_space<vmem>>, vector<1x28x240xf32>
    %11 = vector.shape_cast %10 : vector<1x28x240xf32> to vector<28x240xf32>
    %cst_9 = arith.constant dense<0.000000e+00> : vector<24x240xf32>
    %12 = tpu.matmul %9, %11, %cst_9 {dimension_numbers = #tpu.dot_dimension_numbers<[1], [0], [0], [1], [0, 0, 1, 1], [], []>} : vector<24x28xf32>, vector<28x240xf32>, vector<24x240xf32> -> vector<24x240xf32>
    %13 = arith.addf %8, %12 : vector<24x240xf32>
    %14 = vector.extract_strided_slice %1 {offsets = [2, 0], sizes = [24, 28], strides = [1, 1]} : vector<28x28xf32> to vector<24x28xf32>
    %c2 = arith.constant 2 : index
    %c0_10 = arith.constant 0 : index
    %c0_11 = arith.constant 0 : index
    %15 = vector.load %arg2[%c2, %c0_10, %c0_11] : memref<5x28x240xf32, #tpu.memory_space<vmem>>, vector<1x28x240xf32>
    %16 = vector.shape_cast %15 : vector<1x28x240xf32> to vector<28x240xf32>
    %cst_12 = arith.constant dense<0.000000e+00> : vector<24x240xf32>
    %17 = tpu.matmul %14, %16, %cst_12 {dimension_numbers = #tpu.dot_dimension_numbers<[1], [0], [0], [1], [0, 0, 1, 1], [], []>} : vector<24x28xf32>, vector<28x240xf32>, vector<24x240xf32> -> vector<24x240xf32>
    %18 = arith.addf %13, %17 : vector<24x240xf32>
    %19 = vector.extract_strided_slice %1 {offsets = [3, 0], sizes = [24, 28], strides = [1, 1]} : vector<28x28xf32> to vector<24x28xf32>
    %c3 = arith.constant 3 : index
    %c0_13 = arith.constant 0 : index
    %c0_14 = arith.constant 0 : index
    %20 = vector.load %arg2[%c3, %c0_13, %c0_14] : memref<5x28x240xf32, #tpu.memory_space<vmem>>, vector<1x28x240xf32>
    %21 = vector.shape_cast %20 : vector<1x28x240xf32> to vector<28x240xf32>
    %cst_15 = arith.constant dense<0.000000e+00> : vector<24x240xf32>
    %22 = tpu.matmul %19, %21, %cst_15 {dimension_numbers = #tpu.dot_dimension_numbers<[1], [0], [0], [1], [0, 0, 1, 1], [], []>} : vector<24x28xf32>, vector<28x240xf32>, vector<24x240xf32> -> vector<24x240xf32>
    %23 = arith.addf %18, %22 : vector<24x240xf32>
    %24 = vector.extract_strided_slice %1 {offsets = [4, 0], sizes = [24, 28], strides = [1, 1]} : vector<28x28xf32> to vector<24x28xf32>
    %c4 = arith.constant 4 : index
    %c0_16 = arith.constant 0 : index
    %c0_17 = arith.constant 0 : index
    %25 = vector.load %arg2[%c4, %c0_16, %c0_17] : memref<5x28x240xf32, #tpu.memory_space<vmem>>, vector<1x28x240xf32>
    %26 = vector.shape_cast %25 : vector<1x28x240xf32> to vector<28x240xf32>
    %cst_18 = arith.constant dense<0.000000e+00> : vector<24x240xf32>
    %27 = tpu.matmul %24, %26, %cst_18 {dimension_numbers = #tpu.dot_dimension_numbers<[1], [0], [0], [1], [0, 0, 1, 1], [], []>} : vector<24x28xf32>, vector<28x240xf32>, vector<24x240xf32> -> vector<24x240xf32>
    %28 = arith.addf %23, %27 : vector<24x240xf32>
    %c0_19 = arith.constant 0 : index
    %c0_20 = arith.constant 0 : index
    %c0_21 = arith.constant 0 : index
    %29 = vector.load %arg4[%c0_19, %c0_20, %c0_21] : memref<2x12x24xf32, #tpu.memory_space<vmem>>, vector<1x12x24xf32>
    %30 = vector.shape_cast %29 : vector<1x12x24xf32> to vector<12x24xf32>
    %cst_22 = arith.constant dense<0.000000e+00> : vector<12x240xf32>
    %31 = tpu.matmul %30, %28, %cst_22 {dimension_numbers = #tpu.dot_dimension_numbers<[1], [0], [0], [1], [0, 0, 1, 1], [], []>} : vector<12x24xf32>, vector<24x240xf32>, vector<12x240xf32> -> vector<12x240xf32>
    %c1_23 = arith.constant 1 : index
    %c0_24 = arith.constant 0 : index
    %c0_25 = arith.constant 0 : index
    %32 = vector.load %arg4[%c1_23, %c0_24, %c0_25] : memref<2x12x24xf32, #tpu.memory_space<vmem>>, vector<1x12x24xf32>
    %33 = vector.shape_cast %32 : vector<1x12x24xf32> to vector<12x24xf32>
    %cst_26 = arith.constant dense<0.000000e+00> : vector<12x240xf32>
    %34 = tpu.matmul %33, %28, %cst_26 {dimension_numbers = #tpu.dot_dimension_numbers<[1], [0], [0], [1], [0, 0, 1, 1], [], []>} : vector<12x24xf32>, vector<24x240xf32>, vector<12x240xf32> -> vector<12x240xf32>
    %35 = arith.maximumf %31, %34 : vector<12x240xf32>
    %36 = vector.extract_strided_slice %35 {offsets = [0, 0], sizes = [12, 120], strides = [1, 1]} : vector<12x240xf32> to vector<12x120xf32>
    %37 = vector.extract_strided_slice %35 {offsets = [0, 120], sizes = [12, 120], strides = [1, 1]} : vector<12x240xf32> to vector<12x120xf32>
    %38 = arith.maximumf %36, %37 : vector<12x120xf32>
    %cst_27 = arith.constant 0.000000e+00 : f32
    %39 = vector.broadcast %cst_27 : f32 to vector<12x120xf32>
    %40 = arith.maximumf %38, %39 : vector<12x120xf32>
    %41 = vector.extract_strided_slice %40 {offsets = [0, 0], sizes = [8, 120], strides = [1, 1]} : vector<12x120xf32> to vector<8x120xf32>
    %c0_28 = arith.constant 0 : index
    %c0_29 = arith.constant 0 : index
    %c0_30 = arith.constant 0 : index
    %42 = vector.load %arg5[%c0_28, %c0_29, %c0_30] : memref<5x120x160xf32, #tpu.memory_space<vmem>>, vector<1x120x160xf32>
    %43 = vector.shape_cast %42 : vector<1x120x160xf32> to vector<120x160xf32>
    %cst_31 = arith.constant dense<0.000000e+00> : vector<8x160xf32>
    %44 = tpu.matmul %41, %43, %cst_31 {dimension_numbers = #tpu.dot_dimension_numbers<[1], [0], [0], [1], [0, 0, 1, 1], [], []>} : vector<8x120xf32>, vector<120x160xf32>, vector<8x160xf32> -> vector<8x160xf32>
    %c0_32 = arith.constant 0 : index
    %c0_33 = arith.constant 0 : index
    %45 = vector.load %arg6[%c0_32, %c0_33] : memref<1x160xf32, #tpu.memory_space<vmem>>, vector<1x160xf32>
    %46 = vector.broadcast %45 : vector<1x160xf32> to vector<8x160xf32>
    %47 = arith.addf %44, %46 : vector<8x160xf32>
    %48 = vector.extract_strided_slice %40 {offsets = [1, 0], sizes = [8, 120], strides = [1, 1]} : vector<12x120xf32> to vector<8x120xf32>
    %c1_34 = arith.constant 1 : index
    %c0_35 = arith.constant 0 : index
    %c0_36 = arith.constant 0 : index
    %49 = vector.load %arg5[%c1_34, %c0_35, %c0_36] : memref<5x120x160xf32, #tpu.memory_space<vmem>>, vector<1x120x160xf32>
    %50 = vector.shape_cast %49 : vector<1x120x160xf32> to vector<120x160xf32>
    %cst_37 = arith.constant dense<0.000000e+00> : vector<8x160xf32>
    %51 = tpu.matmul %48, %50, %cst_37 {dimension_numbers = #tpu.dot_dimension_numbers<[1], [0], [0], [1], [0, 0, 1, 1], [], []>} : vector<8x120xf32>, vector<120x160xf32>, vector<8x160xf32> -> vector<8x160xf32>
    %52 = arith.addf %47, %51 : vector<8x160xf32>
    %53 = vector.extract_strided_slice %40 {offsets = [2, 0], sizes = [8, 120], strides = [1, 1]} : vector<12x120xf32> to vector<8x120xf32>
    %c2_38 = arith.constant 2 : index
    %c0_39 = arith.constant 0 : index
    %c0_40 = arith.constant 0 : index
    %54 = vector.load %arg5[%c2_38, %c0_39, %c0_40] : memref<5x120x160xf32, #tpu.memory_space<vmem>>, vector<1x120x160xf32>
    %55 = vector.shape_cast %54 : vector<1x120x160xf32> to vector<120x160xf32>
    %cst_41 = arith.constant dense<0.000000e+00> : vector<8x160xf32>
    %56 = tpu.matmul %53, %55, %cst_41 {dimension_numbers = #tpu.dot_dimension_numbers<[1], [0], [0], [1], [0, 0, 1, 1], [], []>} : vector<8x120xf32>, vector<120x160xf32>, vector<8x160xf32> -> vector<8x160xf32>
    %57 = arith.addf %52, %56 : vector<8x160xf32>
    %58 = vector.extract_strided_slice %40 {offsets = [3, 0], sizes = [8, 120], strides = [1, 1]} : vector<12x120xf32> to vector<8x120xf32>
    %c3_42 = arith.constant 3 : index
    %c0_43 = arith.constant 0 : index
    %c0_44 = arith.constant 0 : index
    %59 = vector.load %arg5[%c3_42, %c0_43, %c0_44] : memref<5x120x160xf32, #tpu.memory_space<vmem>>, vector<1x120x160xf32>
    %60 = vector.shape_cast %59 : vector<1x120x160xf32> to vector<120x160xf32>
    %cst_45 = arith.constant dense<0.000000e+00> : vector<8x160xf32>
    %61 = tpu.matmul %58, %60, %cst_45 {dimension_numbers = #tpu.dot_dimension_numbers<[1], [0], [0], [1], [0, 0, 1, 1], [], []>} : vector<8x120xf32>, vector<120x160xf32>, vector<8x160xf32> -> vector<8x160xf32>
    %62 = arith.addf %57, %61 : vector<8x160xf32>
    %63 = vector.extract_strided_slice %40 {offsets = [4, 0], sizes = [8, 120], strides = [1, 1]} : vector<12x120xf32> to vector<8x120xf32>
    %c4_46 = arith.constant 4 : index
    %c0_47 = arith.constant 0 : index
    %c0_48 = arith.constant 0 : index
    %64 = vector.load %arg5[%c4_46, %c0_47, %c0_48] : memref<5x120x160xf32, #tpu.memory_space<vmem>>, vector<1x120x160xf32>
    %65 = vector.shape_cast %64 : vector<1x120x160xf32> to vector<120x160xf32>
    %cst_49 = arith.constant dense<0.000000e+00> : vector<8x160xf32>
    %66 = tpu.matmul %63, %65, %cst_49 {dimension_numbers = #tpu.dot_dimension_numbers<[1], [0], [0], [1], [0, 0, 1, 1], [], []>} : vector<8x120xf32>, vector<120x160xf32>, vector<8x160xf32> -> vector<8x160xf32>
    %67 = arith.addf %62, %66 : vector<8x160xf32>
    %c0_50 = arith.constant 0 : index
    %c0_51 = arith.constant 0 : index
    %c0_52 = arith.constant 0 : index
    %68 = vector.load %arg7[%c0_50, %c0_51, %c0_52] : memref<2x4x8xf32, #tpu.memory_space<vmem>>, vector<1x4x8xf32>
    %69 = vector.shape_cast %68 : vector<1x4x8xf32> to vector<4x8xf32>
    %cst_53 = arith.constant dense<0.000000e+00> : vector<4x160xf32>
    %70 = tpu.matmul %69, %67, %cst_53 {dimension_numbers = #tpu.dot_dimension_numbers<[1], [0], [0], [1], [0, 0, 1, 1], [], []>} : vector<4x8xf32>, vector<8x160xf32>, vector<4x160xf32> -> vector<4x160xf32>
    %c1_54 = arith.constant 1 : index
    %c0_55 = arith.constant 0 : index
    %c0_56 = arith.constant 0 : index
    %71 = vector.load %arg7[%c1_54, %c0_55, %c0_56] : memref<2x4x8xf32, #tpu.memory_space<vmem>>, vector<1x4x8xf32>
    %72 = vector.shape_cast %71 : vector<1x4x8xf32> to vector<4x8xf32>
    %cst_57 = arith.constant dense<0.000000e+00> : vector<4x160xf32>
    %73 = tpu.matmul %72, %67, %cst_57 {dimension_numbers = #tpu.dot_dimension_numbers<[1], [0], [0], [1], [0, 0, 1, 1], [], []>} : vector<4x8xf32>, vector<8x160xf32>, vector<4x160xf32> -> vector<4x160xf32>
    %74 = arith.maximumf %70, %73 : vector<4x160xf32>
    %75 = vector.extract_strided_slice %74 {offsets = [0, 0], sizes = [4, 80], strides = [1, 1]} : vector<4x160xf32> to vector<4x80xf32>
    %76 = vector.extract_strided_slice %74 {offsets = [0, 80], sizes = [4, 80], strides = [1, 1]} : vector<4x160xf32> to vector<4x80xf32>
    %77 = arith.maximumf %75, %76 : vector<4x80xf32>
    %cst_58 = arith.constant 0.000000e+00 : f32
    %78 = vector.broadcast %cst_58 : f32 to vector<4x80xf32>
    %79 = arith.maximumf %77, %78 : vector<4x80xf32>
    %c0_59 = arith.constant 0 : index
    %c0_60 = arith.constant 0 : index
    %80 = vector.load %arg8[%c0_59, %c0_60] : memref<320x50xf32, #tpu.memory_space<vmem>>, vector<320x50xf32>
    %c0_61 = arith.constant 0 : index
    %c0_62 = arith.constant 0 : index
    %81 = vector.load %arg9[%c0_61, %c0_62] : memref<1x50xf32, #tpu.memory_space<vmem>>, vector<1x50xf32>
    %82 = vector.extract_strided_slice %79 {offsets = [0, 0], sizes = [1, 80], strides = [1, 1]} : vector<4x80xf32> to vector<1x80xf32>
    %83 = vector.extract_strided_slice %80 {offsets = [0, 0], sizes = [80, 50], strides = [1, 1]} : vector<320x50xf32> to vector<80x50xf32>
    %cst_63 = arith.constant dense<0.000000e+00> : vector<1x50xf32>
    %84 = tpu.matmul %82, %83, %cst_63 {dimension_numbers = #tpu.dot_dimension_numbers<[1], [0], [0], [1], [0, 0, 1, 1], [], []>} : vector<1x80xf32>, vector<80x50xf32>, vector<1x50xf32> -> vector<1x50xf32>
    %85 = arith.addf %81, %84 : vector<1x50xf32>
    %86 = vector.extract_strided_slice %79 {offsets = [1, 0], sizes = [1, 80], strides = [1, 1]} : vector<4x80xf32> to vector<1x80xf32>
    %87 = vector.extract_strided_slice %80 {offsets = [80, 0], sizes = [80, 50], strides = [1, 1]} : vector<320x50xf32> to vector<80x50xf32>
    %cst_64 = arith.constant dense<0.000000e+00> : vector<1x50xf32>
    %88 = tpu.matmul %86, %87, %cst_64 {dimension_numbers = #tpu.dot_dimension_numbers<[1], [0], [0], [1], [0, 0, 1, 1], [], []>} : vector<1x80xf32>, vector<80x50xf32>, vector<1x50xf32> -> vector<1x50xf32>
    %89 = arith.addf %85, %88 : vector<1x50xf32>
    %90 = vector.extract_strided_slice %79 {offsets = [2, 0], sizes = [1, 80], strides = [1, 1]} : vector<4x80xf32> to vector<1x80xf32>
    %91 = vector.extract_strided_slice %80 {offsets = [160, 0], sizes = [80, 50], strides = [1, 1]} : vector<320x50xf32> to vector<80x50xf32>
    %cst_65 = arith.constant dense<0.000000e+00> : vector<1x50xf32>
    %92 = tpu.matmul %90, %91, %cst_65 {dimension_numbers = #tpu.dot_dimension_numbers<[1], [0], [0], [1], [0, 0, 1, 1], [], []>} : vector<1x80xf32>, vector<80x50xf32>, vector<1x50xf32> -> vector<1x50xf32>
    %93 = arith.addf %89, %92 : vector<1x50xf32>
    %94 = vector.extract_strided_slice %79 {offsets = [3, 0], sizes = [1, 80], strides = [1, 1]} : vector<4x80xf32> to vector<1x80xf32>
    %95 = vector.extract_strided_slice %80 {offsets = [240, 0], sizes = [80, 50], strides = [1, 1]} : vector<320x50xf32> to vector<80x50xf32>
    %cst_66 = arith.constant dense<0.000000e+00> : vector<1x50xf32>
    %96 = tpu.matmul %94, %95, %cst_66 {dimension_numbers = #tpu.dot_dimension_numbers<[1], [0], [0], [1], [0, 0, 1, 1], [], []>} : vector<1x80xf32>, vector<80x50xf32>, vector<1x50xf32> -> vector<1x50xf32>
    %97 = arith.addf %93, %96 : vector<1x50xf32>
    %cst_67 = arith.constant 0.000000e+00 : f32
    %98 = vector.broadcast %cst_67 : f32 to vector<1x50xf32>
    %99 = arith.maximumf %97, %98 : vector<1x50xf32>
    %c0_68 = arith.constant 0 : index
    %c0_69 = arith.constant 0 : index
    %100 = vector.load %arg10[%c0_68, %c0_69] : memref<50x10xf32, #tpu.memory_space<vmem>>, vector<50x10xf32>
    %cst_70 = arith.constant dense<0.000000e+00> : vector<1x10xf32>
    %101 = tpu.matmul %99, %100, %cst_70 {dimension_numbers = #tpu.dot_dimension_numbers<[1], [0], [0], [1], [0, 0, 1, 1], [], []>} : vector<1x50xf32>, vector<50x10xf32>, vector<1x10xf32> -> vector<1x10xf32>
    %c0_71 = arith.constant 0 : index
    %c0_72 = arith.constant 0 : index
    %102 = vector.load %arg11[%c0_71, %c0_72] : memref<1x10xf32, #tpu.memory_space<vmem>>, vector<1x10xf32>
    %103 = arith.addf %101, %102 : vector<1x10xf32>
    %cst_73 = arith.constant dense<0xFF800000> : vector<1xf32>
    %104 = vector.multi_reduction <maximumf>, %103, %cst_73 [1] : vector<1x10xf32> to vector<1xf32>
    %105 = vector.shape_cast %104 : vector<1xf32> to vector<1x1xf32>
    %106 = vector.broadcast %105 : vector<1x1xf32> to vector<1x10xf32>
    %107 = arith.subf %103, %106 : vector<1x10xf32>
    %108 = math.exp %107 : vector<1x10xf32>
    %cst_74 = arith.constant dense<0.000000e+00> : vector<1xf32>
    %109 = vector.multi_reduction <add>, %108, %cst_74 [1] : vector<1x10xf32> to vector<1xf32>
    %110 = vector.shape_cast %109 : vector<1xf32> to vector<1x1xf32>
    %111 = math.log %110 : vector<1x1xf32>
    %112 = vector.broadcast %111 : vector<1x1xf32> to vector<1x10xf32>
    %113 = arith.subf %107, %112 : vector<1x10xf32>
    %114 = vector.shape_cast %113 : vector<1x10xf32> to vector<1x1x10xf32>
    %c0_75 = arith.constant 0 : index
    %c0_76 = arith.constant 0 : index
    %c0_77 = arith.constant 0 : index
    %115 = vector.load %arg12[%c0_75, %c0_76, %c0_77] : memref<1x1x10xf32, #tpu.memory_space<vmem>>, vector<1x1x10xf32>
    tpu.vector_store %arg12[%c0_75, %c0_76, %c0_77], %114 {strides = array<i32>} : memref<1x1x10xf32, #tpu.memory_space<vmem>>, vector<1x1x10xf32>,
    return
  }
  func.func @transform_0(%arg0: i32) -> (i32, i32, i32) {
    %c0_i32 = arith.constant 0 : i32
    %c0_i32_0 = arith.constant 0 : i32
    %c0_i32_1 = arith.constant 0 : i32
    return %arg0, %c0_i32, %c0_i32_0 : i32, i32, i32
  }
  func.func @transform_1(%arg0: i32) -> (i32, i32, i32) {
    %c0_i32 = arith.constant 0 : i32
    %c0_i32_0 = arith.constant 0 : i32
    %c0_i32_1 = arith.constant 0 : i32
    %c0_i32_2 = arith.constant 0 : i32
    return %c0_i32, %c0_i32_0, %c0_i32_1 : i32, i32, i32
  }
  func.func @transform_2(%arg0: i32) -> (i32, i32) {
    %c0_i32 = arith.constant 0 : i32
    %c0_i32_0 = arith.constant 0 : i32
    %c0_i32_1 = arith.constant 0 : i32
    return %c0_i32, %c0_i32_0 : i32, i32
  }
  func.func @transform_3(%arg0: i32) -> (i32, i32, i32) {
    %c0_i32 = arith.constant 0 : i32
    %c0_i32_0 = arith.constant 0 : i32
    %c0_i32_1 = arith.constant 0 : i32
    %c0_i32_2 = arith.constant 0 : i32
    return %c0_i32, %c0_i32_0, %c0_i32_1 : i32, i32, i32
  }
  func.func @transform_4(%arg0: i32) -> (i32, i32, i32) {
    %c0_i32 = arith.constant 0 : i32
    %c0_i32_0 = arith.constant 0 : i32
    %c0_i32_1 = arith.constant 0 : i32
    %c0_i32_2 = arith.constant 0 : i32
    return %c0_i32, %c0_i32_0, %c0_i32_1 : i32, i32, i32
  }
  func.func @transform_5(%arg0: i32) -> (i32, i32) {
    %c0_i32 = arith.constant 0 : i32
    %c0_i32_0 = arith.constant 0 : i32
    %c0_i32_1 = arith.constant 0 : i32
    return %c0_i32, %c0_i32_0 : i32, i32
  }
  func.func @transform_6(%arg0: i32) -> (i32, i32, i32) {
    %c0_i32 = arith.constant 0 : i32
    %c0_i32_0 = arith.constant 0 : i32
    %c0_i32_1 = arith.constant 0 : i32
    %c0_i32_2 = arith.constant 0 : i32
    return %c0_i32, %c0_i32_0, %c0_i32_1 : i32, i32, i32
  }
  func.func @transform_7(%arg0: i32) -> (i32, i32) {
    %c0_i32 = arith.constant 0 : i32
    %c0_i32_0 = arith.constant 0 : i32
    %c0_i32_1 = arith.constant 0 : i32
    return %c0_i32, %c0_i32_0 : i32, i32
  }
  func.func @transform_8(%arg0: i32) -> (i32, i32) {
    %c0_i32 = arith.constant 0 : i32
    %c0_i32_0 = arith.constant 0 : i32
    %c0_i32_1 = arith.constant 0 : i32
    return %c0_i32, %c0_i32_0 : i32, i32
  }
  func.func @transform_9(%arg0: i32) -> (i32, i32) {
    %c0_i32 = arith.constant 0 : i32
    %c0_i32_0 = arith.constant 0 : i32
    %c0_i32_1 = arith.constant 0 : i32
    return %c0_i32, %c0_i32_0 : i32, i32
  }
  func.func @transform_10(%arg0: i32) -> (i32, i32) {
    %c0_i32 = arith.constant 0 : i32
    %c0_i32_0 = arith.constant 0 : i32
    %c0_i32_1 = arith.constant 0 : i32
    return %c0_i32, %c0_i32_0 : i32, i32
  }
  func.func @transform_11(%arg0: i32) -> (i32, i32, i32) {
    %c0_i32 = arith.constant 0 : i32
    %c0_i32_0 = arith.constant 0 : i32
    %c0_i32_1 = arith.constant 0 : i32
    return %arg0, %c0_i32, %c0_i32_0 : i32, i32, i32
  }
}

</mosaic_0001>

<bundles_post_ra>
// kernel: net_forward.1
= control target key start
LH: loop header
LB: loop body
LE: loop exit
PB: predicated region body
PF: predicated region fallthrough
CT: control target
= control target key end

     0   :  { %s3974_s0 = inlined_call_operand.vmem [shape: f32[2,28,28], index: 0, kind: input, shape index: {}]   ;;  %s3975_s1 = inlined_call_operand.vmem [shape: f32[5,28,240], index: 1, kind: input, shape index: {}]   ;;  %s3976_s2 = inlined_call_operand.vmem [shape: f32[1,240], index: 2, kind: input, shape index: {}]   ;;  %s3977_s3 = inlined_call_operand.vmem [shape: f32[2,12,24], index: 3, kind: input, shape index: {}]   ;;  %s3978_s4 = inlined_call_operand.vmem [shape: f32[5,120,160], index: 4, kind: input, shape index: {}]   ;;  %s3979_s5 = inlined_call_operand.vmem [shape: f32[1,160], index: 5, kind: input, shape index: {}]   ;;  %s3980_s6 = inlined_call_operand.vmem [shape: f32[2,4,8], index: 6, kind: input, shape index: {}]   ;;  %s3981_s7 = inlined_call_operand.vmem [shape: f32[320,50], index: 7, kind: input, shape index: {}]   ;;  %s3982_s8 = inlined_call_operand.vmem [shape: f32[1,50], index: 8, kind: input, shape index: {}]   ;;  %s3983_s9 = inlined_call_operand.vmem [shape: f32[50,10], index: 9, kind: input, shape index: {}]   ;;  %s3984_s10 = inlined_call_operand.vmem [shape: f32[1,10], index: 10, kind: input, shape index: {}]   ;;  %s3985_s11 = inlined_call_operand.hbm [shape: f32[2,1,10], index: 11, kind: output, shape index: {}]  }
   0x1   :  { %3986 = sst [smem:[#allocation6_spill]] %s3974_s0 }
   0x2   :  { %16 = vsyncpa [#allocation3], 0 }
   0x3   :  { %18 = vsyncpa [#allocation3 + $0x1], 0  ;;  %s2944_s17 = smov 0   ;;  %s2946_s18 = smov 0  }
   0x4   :  { %s2948_s19 = smov 0   ;;  %s2950_s20 = smov 0  }
   0x5 LB: > { %s2965_s21 = sadd.s32 4294967295, %s2877_s20   ;;  %s2402_s22 = sadd.s32 4294967294, %s2877_s20   ;;  %s2877_s20 = sphi %s2950_s20, %s3995_s20   ;;  %s2873_s19 = sphi %s2948_s19, %s3994_s19   ;;  %s2869_s18 = sphi %s2946_s18, %s3993_s18   ;;  %s2865_s17 = sphi %s2944_s17, %s3992_s17  }
   0x6   : > { %s2969_s23 = sadd.s32 1, %s2877_s20   ;;  %s267_s24 = sadd.s32 1, %s2873_s19 }
   0x7   : > { %s264_s25 = ssub.s32 %s2877_s20, %s2969_s23  ;;  %p277_p0 = scmp.ne.s32.totalorder %s2873_s19, %s2869_s18 }
   0x8   : > { %p265_p1 = scmp.eq.s32.totalorder %s264_s25, 0  ;;  %p278_p2 = scmp.eq.s32.totalorder %s2965_s21, 1 }
   0x9   : > { %p283_p3 = scmp.ne.s32.totalorder %s2869_s18, %s2865_s17  ;;  %p284_p4 = scmp.eq.s32.totalorder %s2402_s22, 1 }
   0xa   : > { %s2980_s26 = scalar_select %p265_p1, %s2873_s19, %s267_s24  }
   0xb   : > { %p2982_p5 = por %p278_p2, %p277_p0  ;;  %p2986_p6 = por %p284_p4, %p283_p3 }
   0xc   : > { %3987 = sst [smem:[#allocation5_spill]] %s2980_s26  ;;  %p2405_p7 = scmp.ge.s32.totalorder %s2877_s20, 1 }
   0xd   : > { %p340_p8 = scmp.lt.s32.totalorder %s2877_s20, 3 }
   0xf   : > { %p341_p9 = pnand %p2405_p7, %p340_p8 }
  0x10   : > { %p379_p10 = scmp.lt.s32.totalorder (!%p341_p9), %s2965_s21, 1  ;;  %s3990_s0 = sld [smem:[#allocation6_spill]] (!%p341_p9) }
  0x11   : > { %344 = sbr.rel (%p341_p9) target bundleno = 1917 (0x77d), region = 64  ;;  %s2880_s24 = smov (!%p341_p9), 8  }
  0x12   : > { %s2882_s16 = smov (!%p341_p9), 48   ;;  %s377_s26 = sand.u32 (!%p341_p9), 1, %s2869_s18  }
  0x16   : > { %v395_v0 = vld [vmem:[%s3975_s1 + $0x38] sm:$0xf]  ;;  %vm418_vm0 = vcmask 1043456   ;;  %v394_v1 = vld [vmem:[%s3975_s1 + $0x30] sm:$0xf]  ;;  %v393_v2 = vld [vmem:[%s3975_s1 + $0x28] sm:$0xff] }
  0x17   : > { %2408 = vmatprep.subr.msk.mxu0 %vm418_vm0, %v395_v0  ;;  %v2420_v3 = vld [vmem:[%s3975_s1 + $0x78] sm:$0xf]  ;;  %v392_v4 = vld [vmem:[%s3975_s1 + $0x20] sm:$0xff]  ;;  %v2419_v5 = vld [vmem:[%s3975_s1 + $0x70] sm:$0xf]  ;;  %s380_s14 = scalar_select %p379_p10, %s2965_s21, 1 }
  0x18   : > { %2409 = vmatpush1.msk.msra.mxu0 %vm418_vm0, %v394_v1  ;;  %2421 = vmatprep.subr.msk.mxu1 %vm418_vm0, %v2420_v3  ;;  %v391_v6 = vld [vmem:[%s3975_s1 + $0x18] sm:$0xff]  ;;  %v2418_v7 = vld [vmem:[%s3975_s1 + $0x68] sm:$0xff]  ;;  %v390_v8 = vld [vmem:[%s3975_s1 + $0x10] sm:$0xff]  ;;  %vm408_vm1 = vcmask 228352   ;;  %v2879_v15 = vmov 0.0   ;;  %vm518_vm2 = vcmask 1046528  }
  0x19   : > { %451 = vmatprep.subr.mxu0 %v393_v2  ;;  %2422 = vmatpush1.msk.msra.mxu1 %vm418_vm0, %v2419_v5  ;;  %v2417_v9 = vld [vmem:[%s3975_s1 + $0x60] sm:$0xff]  ;;  %v2416_v10 = vld [vmem:[%s3975_s1 + $0x58] sm:$0xff]  ;;  %v389_v11 = vld [vmem:[%s3975_s1 + $0x8] sm:$0xff]  ;;  %s2608_s25 = sshll.u32 %s380_s14, 5  ;;  %vm636_vm3 = vcmask 1045504   ;;  %vm754_vm4 = vcmask 1044480  }
  0x1a   : > { %452 = vmatpush1.msra.mxu0 %v392_v4  ;;  %564 = vmatprep.subr.mxu1 %v2418_v7  ;;  %v388_v12 = vld [vmem:[%s3975_s1] sm:$0xff]  ;;  %v2415_v13 = vld [vmem:[%s3975_s1 + $0x50] sm:$0xff]  ;;  %v2414_v14 = vld [vmem:[%s3975_s1 + $0x48] sm:$0xff]  ;;  %s383_s15 = scalar_lea.vmem %s3990_s0, %s2608_s25  ;;  %vm982_vm5 = vcmask 195584   ;;  %vm1168_vm6 = vcmask 64512   ;;  %vm1219_vm7 = vcmask 982016  }
  0x1b   : > { %453 = vmatprep.subr.mxu0 %v391_v6  ;;  %565 = vmatpush1.msra.mxu1 %v2417_v9  ;;  %v2413_v16 = vld [vmem:[%s3975_s1 + $0x40] sm:$0xff]  ;;  %v2433_v17 = vld [vmem:[%s3975_s1 + $0xb8] sm:$0xf]  ;;  %v3055_v19 = vld [vmem:[%s383_s15 + $0x8] sm:$0xff]  ;;  %vm2881_vm8 = vmmov 0   ;;  %vm1890_vm9 = vcmask 392192  }
  0x1c   : > { %454 = vmatpush1.msra.mxu0 %v390_v8  ;;  %566 = vmatprep.subr.mxu1 %v2416_v10  ;;  %v3053_v18 = vld [vmem:[%s383_s15] sm:$0xff]  ;;  %v3057_v20 = vld [vmem:[%s383_s15 + $0x10] sm:$0xff]  ;;  %v2446_v23 = vld [vmem:[%s3975_s1 + $0xf8] sm:$0xf]  ;;  %v520_v24 = vrot.slane %v3055_v19, 1  ;;  %v638_v38 = vrot.slane %v3055_v19, 2 }
  0x1d   : > { %455 = vmatprep.subr.mxu0 %v389_v11  ;;  %489 = vmatprep.mubr.f32.mxu0 %v2879_v15  ;;  %v519_v21 = vrot.slane %v3053_v18, 1  ;;  %v2432_v22 = vld [vmem:[%s3975_s1 + $0xb0] sm:$0xf]  ;;  %v522_v25 = vrot.slane %v3057_v20, 1  ;;  %v2431_v26 = vld [vmem:[%s3975_s1 + $0xa8] sm:$0xff]  ;;  %v2430_v29 = vld [vmem:[%s3975_s1 + $0xa0] sm:$0xff] }
  0x1e   : > { %456 = vmatpush1.msra.mxu0 %v388_v12  ;;  %567 = vmatpush1.msra.mxu1 %v2415_v13  ;;  %v3076_v27 = vld [vmem:[%s383_s15 + $0x18] sm:$0xf]  ;;  %v2445_v30 = vld [vmem:[%s3975_s1 + $0xf0] sm:$0xf]  ;;  %v2444_v34 = vld [vmem:[%s3975_s1 + $0xe8] sm:$0xff]  ;;  %v637_v35 = vrot.slane %v3053_v18, 2 }
  0x1f   : > { %2410 = vmatmul.mubr.msk.f32.vlgmr.msra.gmra.mxu0 %vm408_vm1, %v3053_v18  ;;  %568 = vmatprep.subr.mxu1 %v2414_v14  ;;  %v521_v28 = vsel %vm518_vm2, %v519_v21, %v520_v24  ;;  %v2429_v31 = vld [vmem:[%s3975_s1 + $0x98] sm:$0xff]  ;;  %v523_v32 = vsel %vm518_vm2, %v520_v24, %v522_v25  ;;  %v524_v33 = vrot.slane %v3076_v27, 1  ;;  %v2428_v36 = vld [vmem:[%s3975_s1 + $0x90] sm:$0xff]  ;;  %v2443_v37 = vld [vmem:[%s3975_s1 + $0xe0] sm:$0xff]  ;;  %v755_v41 = vrot.slane %v3053_v18, 3  ;;  %s2605_s14 = sshll.u32 %s2965_s21, 4 }
  0x20   : > { %569 = vmatpush1.msra.mxu1 %v2413_v16  ;;  %602 = vmatprep.mubr.f32.mxu1 %v2879_v15  ;;  %v2427_v39 = vld [vmem:[%s3975_s1 + $0x88] sm:$0xff]  ;;  %v2442_v40 = vld [vmem:[%s3975_s1 + $0xd8] sm:$0xff]  ;;  %v2426_v43 = vld [vmem:[%s3975_s1 + $0x80] sm:$0xff]  ;;  %v756_v44 = vrot.slane %v3055_v19, 3  ;;  %v639_v46 = vsel %vm636_vm3, %v637_v35, %v638_v38  ;;  %v640_v48 = vrot.slane %v3057_v20, 2  ;;  %v758_v51 = vrot.slane %v3057_v20, 3  ;;  %s2345_s13 = scalar_lea.hbm %s3985_s11, %s2605_s14 }
  0x21   : > { %495 = vmatprep.mubr.f32.mxu0 %v2879_v15  ;;  %2434 = vmatprep.subr.msk.mxu0 %vm418_vm0, %v2433_v17  ;;  %v525_v42 = vsel %vm518_vm2, %v522_v25, %v524_v33  ;;  %v2441_v45 = vld [vmem:[%s3975_s1 + $0xd0] sm:$0xff]  ;;  %v2440_v47 = vld [vmem:[%s3975_s1 + $0xc8] sm:$0xff]  ;;  %v2439_v49 = vld [vmem:[%s3975_s1 + $0xc0] sm:$0xff]  ;;  %v642_v54 = vrot.slane %v3076_v27, 2  ;;  %v760_v58 = vrot.slane %v3076_v27, 3  ;;  %v872_v60 = vrot.slane %v3053_v18, 4 }
  0x22   : > { %2435 = vmatpush1.msk.msra.mxu0 %vm418_vm0, %v2432_v22  ;;  %2447 = vmatprep.subr.msk.mxu1 %vm418_vm0, %v2446_v23  ;;  %v757_v50 = vsel %vm754_vm4, %v755_v41, %v756_v44  ;;  %v2459_v52 = vld [vmem:[%s3975_s1 + $0x138] sm:$0xf]  ;;  %v641_v53 = vsel %vm636_vm3, %v638_v38, %v640_v48  ;;  %v2458_v55 = vld [vmem:[%s3975_s1 + $0x130] sm:$0xf]  ;;  %v759_v56 = vsel %vm754_vm4, %v756_v44, %v758_v51  ;;  %v2457_v57 = vld [vmem:[%s3975_s1 + $0x128] sm:$0xff]  ;;  %v873_v63 = vrot.slane %v3055_v19, 4 }
  0x23   : > { %2423 = vmatmul.mubr.msk.f32.vlgmr.msra.gmra.mxu1 %vm408_vm1, %v521_v28  ;;  %2411 = vmatmul.mubr.msk.f32.gmra.mxu0 %vm408_vm1, %v3055_v19  ;;  %v2456_v59 = vld [vmem:[%s3975_s1 + $0x120] sm:$0xff]  ;;  %v643_v61 = vsel %vm636_vm3, %v640_v48, %v642_v54  ;;  %v2455_v62 = vld [vmem:[%s3975_s1 + $0x118] sm:$0xff]  ;;  %v2454_v0 = vld [vmem:[%s3975_s1 + $0x110] sm:$0xff]  ;;  %v761_v1 = vsel %vm754_vm4, %v758_v51, %v760_v58  ;;  %v875_v5 = vrot.slane %v3057_v20, 4  ;;  %v877_v7 = vrot.slane %v3076_v27, 4  ;;  %s378_s25 = scalar_lea.vmem [#allocation2], %s377_s26 }
  0x24   : > { %608 = vmatprep.mubr.f32.mxu1 %v2879_v15  ;;  %682 = vmatprep.subr.mxu0 %v2431_v26  ;;  %v2453_v2 = vld [vmem:[%s3975_s1 + $0x108] sm:$0xff]  ;;  %v2452_v3 = vld [vmem:[%s3975_s1 + $0x100] sm:$0xff]  ;;  %v874_v4 = vsel %vm418_vm0, %v872_v60, %v873_v63  ;;  %vm1936_vm10 = vcmask 654336   ;;  %vm2246_vm11 = vcmask 1041408   ;;  %vm2242_vm12 = vcmask 408576   ;;  %s2347_s29 = sshll.u32 %s378_s25, 4  ;;  %s2348_s29 = int_to_ptr.vmem [resolvable:$true] %s2347_s29 }
  0x25   : > { %501 = vmatprep.mubr.f32.mxu0 %v2879_v15  ;;  %683 = vmatpush1.msra.mxu0 %v2430_v29  ;;  %v876_v6 = vsel %vm418_vm0, %v873_v63, %v875_v5  ;;  %v878_v8 = vsel %vm418_vm0, %v875_v5, %v877_v7  ;;  %v396_v33 = vld [vmem:[%s3976_s2] sm:$0x3]  ;;  %vm2320_vm13 = vcmask 73728   ;;  %s2817_s22 = scalar_lea.vmem %s2348_s29, 16 }
  0x26   : > { %2448 = vmatpush1.msk.msra.mxu1 %vm418_vm0, %v2445_v30  ;;  %684 = vmatprep.subr.mxu0 %v2429_v31  ;;  %p2818_p11 = scmp.ne.s32.totalorder %s2348_s29, %s2817_s22 }
  0x27   : > { %2424 = vmatmul.mubr.msk.f32.gmra.mxu1 %vm408_vm1, %v523_v32  ;;  %2412 = vmatmul.mubr.msk.f32.gmra.mxu0 %vm408_vm1, %v3057_v20  ;;  %v398_v20 = vlaneseq }
  0x28   : > { %800 = vmatprep.subr.mxu1 %v2444_v34  ;;  %614 = vmatprep.mubr.f32.mxu1 %v2879_v15  ;;  %p2819_p12 = pnand %p2818_p11, %p2982_p5 }
  0x29   : > { %685 = vmatpush1.msra.mxu0 %v2428_v36  ;;  %801 = vmatpush1.msra.mxu1 %v2443_v37  ;;  %v3198_v24 = vshrl.u32 %v398_v20, 7  ;;  %v1204_v20 = vld [vmem:[%s3978_s4 + $0xd8] sm:$0xff] }
  0x2a   : > { %686 = vmatprep.subr.mxu0 %v2427_v39  ;;  %802 = vmatprep.subr.mxu1 %v2442_v40  ;;  %p2820_p13 = pneg %p2819_p12 }
  0x2b   : > { %2425 = vmatmul.mubr.msk.f32.gmra.mxu1 %vm408_vm1, %v525_v42  ;;  %687 = vmatpush1.msra.mxu0 %v2426_v43  ;;  %v404_v29 = vsub.s32 1, %v3198_v24  ;;  %v400_v30 = vsub.s32 0, %v3198_v24  ;;  %v1731_v24 = vld [vmem:[%s3980_s6] sm:$0xf] }
  0x2c   : > { %720 = vmatprep.mubr.f32.mxu0 %v2879_v15  ;;  %803 = vmatpush1.msra.mxu1 %v2441_v45 }
  0x2d   : > { %2436 = vmatmul.mubr.msk.f32.vlgmr.msra.gmra.mxu0 %vm408_vm1, %v639_v46  ;;  %804 = vmatprep.subr.mxu1 %v2440_v47  ;;  %v405_v35 = vrot.slane %v396_v33, %v404_v29  ;;  %v401_v36 = vrot.slane %v396_v33, %v400_v30  ;;  %v2497_v33 = vld [vmem:[%s3978_s4 + $0x1b8] sm:$0xff] }
  0x2e   : > { %805 = vmatpush1.msra.mxu1 %v2439_v49  ;;  %838 = vmatprep.mubr.f32.mxu1 %v2879_v15 }
  0x2f   : > { %2449 = vmatmul.mubr.msk.f32.vlgmr.msra.gmra.mxu1 %vm408_vm1, %v757_v50  ;;  %726 = vmatprep.mubr.f32.mxu0 %v2879_v15 }
  0x30   : > { %2460 = vmatprep.subr.msk.mxu0 %vm418_vm0, %v2459_v52  ;;  %844 = vmatprep.mubr.f32.mxu1 %v2879_v15 }
  0x31   : > { %2437 = vmatmul.mubr.msk.f32.gmra.mxu0 %vm408_vm1, %v641_v53 }
  0x32   : > { %2461 = vmatpush1.msk.msra.mxu0 %vm418_vm0, %v2458_v55  ;;  %732 = vmatprep.mubr.f32.mxu0 %v2879_v15 }
  0x33   : > { %2450 = vmatmul.mubr.msk.f32.gmra.mxu1 %vm408_vm1, %v759_v56  ;;  %917 = vmatprep.subr.mxu0 %v2457_v57 }
  0x34   : > { %918 = vmatpush1.msra.mxu0 %v2456_v59  ;;  %850 = vmatprep.mubr.f32.mxu1 %v2879_v15 }
  0x35   : > { %2438 = vmatmul.mubr.msk.f32.gmra.mxu0 %vm408_vm1, %v643_v61  ;;  %919 = vmatprep.subr.mxu0 %v2455_v62 }
  0x36   : > { %920 = vmatpush1.msra.mxu0 %v2454_v0  ;;  %955 = vmatprep.mubr.f32.mxu0 %v2879_v15 }
  0x37   : > { %2451 = vmatmul.mubr.msk.f32.gmra.mxu1 %vm408_vm1, %v761_v1  ;;  %921 = vmatprep.subr.mxu0 %v2453_v2 }
  0x38   : > { %922 = vmatpush1.msra.mxu0 %v2452_v3  ;;  %1053 = vmatprep.mubr.f32.mxu1 %v2879_v15 }
  0x39   : > { %2462 = vmatmul.mubr.msk.f32.vlgmr.msra.gmra.mxu0 %vm408_vm1, %v874_v4 }
  0x3a   : > { %961 = vmatprep.mubr.f32.mxu0 %v2879_v15 }
  0x3d   : > { %2463 = vmatmul.mubr.msk.f32.gmra.mxu0 %vm408_vm1, %v876_v6 }
  0x3e   : > { %967 = vmatprep.mubr.f32.mxu0 %v2879_v15 }
  0x41   : > { %2464 = vmatmul.mubr.msk.f32.gmra.mxu0 %vm408_vm1, %v878_v8 }
  0x42   : > { %1287 = vmatprep.mubr.f32.mxu0 %v2879_v15 }
  0xdf   : > { %v491_v9 = vpop.f32.mrf.mxu0 }
  0xe0   : > { %v492_v48 = vadd.f32 %v491_v9, %v401_v36 }
  0xe1   : > { %v493_v10 = vpop.f32.mrf.mxu0 }
  0xe2   : > { %v494_v46 = vadd.f32 %v493_v10, %v405_v35 }
  0xe3   : > { %v604_v11 = vpop.f32.mrf.mxu1  ;;  %v497_v12 = vpop.f32.mrf.mxu0 }
  0xe4   : > { %v498_v43 = vadd.f32 %v497_v12, %v401_v36  ;;  %v621_v59 = vadd.f32 %v604_v11, %v492_v48  ;;  %v2489_v48 = vld [vmem:[%s3978_s4 + $0x178] sm:$0xff] }
  0xe5   : > { %v606_v13 = vpop.f32.mrf.mxu1  ;;  %v499_v14 = vpop.f32.mrf.mxu0 }
  0xe6   : > { %v500_v42 = vadd.f32 %v499_v14, %v405_v35  ;;  %v622_v57 = vadd.f32 %v606_v13, %v494_v46  ;;  %v980_v13 = vld [vmem:[%s3977_s3] sm:$0xff]  ;;  %v981_v14 = vld [vmem:[%s3977_s3 + $0x8] sm:$0xf] }
  0xe7   : > { %v610_v16 = vpop.f32.mrf.mxu1  ;;  %v503_v17 = vpop.f32.mrf.mxu0  ;;  %v2490_v46 = vld [vmem:[%s3978_s4 + $0x180] sm:$0xff] }
  0xe8   : > { %v504_v40 = vadd.f32 %v503_v17, %v401_v36  ;;  %v623_v53 = vadd.f32 %v610_v16, %v498_v43  ;;  %v2467_v16 = vld [vmem:[%s3977_s3 + $0x10] sm:$0xff]  ;;  %v2468_v17 = vld [vmem:[%s3977_s3 + $0x18] sm:$0xf]  ;;  %v2495_v36 = vld [vmem:[%s3978_s4 + $0x1a8] sm:$0xff] }
  0xe9   : > { %v612_v18 = vpop.f32.mrf.mxu1  ;;  %v505_v19 = vpop.f32.mrf.mxu0  ;;  %v1194_v43 = vld [vmem:[%s3978_s4 + $0x88] sm:$0xff] }
  0xea   : > { %v506_v39 = vadd.f32 %v505_v19, %v405_v35  ;;  %v624_v51 = vadd.f32 %v612_v18, %v500_v42  ;;  %v1206_v18 = vld [vmem:[%s3978_s4 + $0xe8] sm:$0xff]  ;;  %v1205_v19 = vld [vmem:[%s3978_s4 + $0xe0] sm:$0xff]  ;;  %v2496_v35 = vld [vmem:[%s3978_s4 + $0x1b0] sm:$0xff] }
  0xeb   : > { %v616_v21 = vpop.f32.mrf.mxu1  ;;  %1225 = vmatprep.subr.mxu0 %v1206_v18  ;;  %v2492_v42 = vld [vmem:[%s3978_s4 + $0x190] sm:$0xff] }
  0xec   : > { %v625_v49 = vadd.f32 %v616_v21, %v504_v40  ;;  %v1203_v21 = vld [vmem:[%s3978_s4 + $0xd0] sm:$0xff]  ;;  %1226 = vmatpush1.msra.mxu0 %v1205_v19  ;;  %v2493_v40 = vld [vmem:[%s3978_s4 + $0x198] sm:$0xff] }
  0xed   : > { %v618_v22 = vpop.f32.mrf.mxu1  ;;  %v722_v23 = vpop.f32.mrf.mxu0  ;;  %1227 = vmatprep.subr.mxu0 %v1204_v20  ;;  %v2476_v19 = vld [vmem:[%s3978_s4 + $0x110] sm:$0xff] }
  0xee   : > { %v626_v47 = vadd.f32 %v618_v22, %v506_v39  ;;  %v739_v0 = vadd.f32 %v722_v23, %v621_v59  ;;  %v1202_v22 = vld [vmem:[%s3978_s4 + $0xc8] sm:$0xff]  ;;  %v2501_v23 = vld [vmem:[%s3978_s4 + $0x1d8] sm:$0xff]  ;;  %1228 = vmatpush1.msra.mxu0 %v1203_v21  ;;  %v2486_v59 = vld [vmem:[%s3978_s4 + $0x160] sm:$0xff] }
  0xef   : > { %v724_v25 = vpop.f32.mrf.mxu0  ;;  %v840_v26 = vpop.f32.mrf.mxu1  ;;  %1229 = vmatprep.subr.mxu0 %v1202_v22  ;;  %v1196_v39 = vld [vmem:[%s3978_s4 + $0x98] sm:$0xff]  ;;  %v2475_v21 = vld [vmem:[%s3978_s4 + $0x108] sm:$0xff] }
  0xf0   : > { %v740_v62 = vadd.f32 %v724_v25, %v622_v57  ;;  %v857_v9 = vadd.f32 %v840_v26, %v739_v0  ;;  %v1201_v25 = vld [vmem:[%s3978_s4 + $0xc0] sm:$0xff]  ;;  %v2500_v26 = vld [vmem:[%s3978_s4 + $0x1d0] sm:$0xff] }
  0xf1   : > { %v728_v27 = vpop.f32.mrf.mxu0  ;;  %v842_v28 = vpop.f32.mrf.mxu1  ;;  %1230 = vmatpush1.msra.mxu0 %v1201_v25  ;;  %v1185_v57 = vld [vmem:[%s3978_s4 + $0x40] sm:$0xff]  ;;  %v2473_v25 = vld [vmem:[%s3978_s4 + $0xf8] sm:$0xff] }
  0xf2   : > { %v741_v60 = vadd.f32 %v728_v27, %v623_v53  ;;  %v858_v7 = vadd.f32 %v842_v28, %v740_v62  ;;  %v1200_v27 = vld [vmem:[%s3978_s4 + $0xb8] sm:$0xff]  ;;  %v2499_v28 = vld [vmem:[%s3978_s4 + $0x1c8] sm:$0xff]  ;;  %v1189_v53 = vld [vmem:[%s3978_s4 + $0x60] sm:$0xff] }
  0xf3   : > { %v730_v31 = vpop.f32.mrf.mxu0  ;;  %v846_v32 = vpop.f32.mrf.mxu1  ;;  %1231 = vmatprep.subr.mxu0 %v1200_v27  ;;  %v1182_v62 = vld [vmem:[%s3978_s4 + $0x28] sm:$0xff]  ;;  %v1181_v0 = vld [vmem:[%s3978_s4 + $0x20] sm:$0xff]  ;;  %v2472_v27 = vld [vmem:[%s3978_s4 + $0xf0] sm:$0xff] }
  0xf4   : > { %v742_v58 = vadd.f32 %v730_v31, %v624_v51  ;;  %v859_v5 = vadd.f32 %v846_v32, %v741_v60  ;;  %v2498_v31 = vld [vmem:[%s3978_s4 + $0x1c0] sm:$0xff]  ;;  %v1199_v32 = vld [vmem:[%s3978_s4 + $0xb0] sm:$0xff]  ;;  %v1190_v51 = vld [vmem:[%s3978_s4 + $0x68] sm:$0xff] }
  0xf5   : > { %v734_v34 = vpop.f32.mrf.mxu0  ;;  %v848_v37 = vpop.f32.mrf.mxu1  ;;  %1232 = vmatpush1.msra.mxu0 %v1199_v32  ;;  %v1183_v60 = vld [vmem:[%s3978_s4 + $0x30] sm:$0xff]  ;;  %v2563_v32 = vld [vmem:[%s3978_s4 + $0x3b8] sm:$0xff] }
  0xf6   : > { %v743_v54 = vadd.f32 %v734_v34, %v625_v49  ;;  %v860_v3 = vadd.f32 %v848_v37, %v742_v58  ;;  %v1198_v34 = vld [vmem:[%s3978_s4 + $0xa8] sm:$0xff]  ;;  %v1197_v37 = vld [vmem:[%s3978_s4 + $0xa0] sm:$0xff]  ;;  %v1191_v49 = vld [vmem:[%s3978_s4 + $0x70] sm:$0xff] }
  0xf7   : > { %v736_v38 = vpop.f32.mrf.mxu0  ;;  %v852_v44 = vpop.f32.mrf.mxu1  ;;  %1233 = vmatprep.subr.mxu0 %v1198_v34  ;;  %v1184_v58 = vld [vmem:[%s3978_s4 + $0x38] sm:$0xff] }
  0xf8   : > { %v744_v52 = vadd.f32 %v736_v38, %v626_v47  ;;  %v861_v1 = vadd.f32 %v852_v44, %v743_v54  ;;  %v2494_v38 = vld [vmem:[%s3978_s4 + $0x1a0] sm:$0xff]  ;;  %1234 = vmatpush1.msra.mxu0 %v1197_v37  ;;  %v2491_v44 = vld [vmem:[%s3978_s4 + $0x188] sm:$0xff]  ;;  %v1192_v47 = vld [vmem:[%s3978_s4 + $0x78] sm:$0xff] }
  0xf9   : > { %v957_v41 = vpop.f32.mrf.mxu0  ;;  %v854_v55 = vpop.f32.mrf.mxu1  ;;  %1235 = vmatprep.subr.mxu0 %v1196_v39  ;;  %v1188_v54 = vld [vmem:[%s3978_s4 + $0x58] sm:$0xff] }
  0xfa   : > { %v862_v63 = vadd.f32 %v854_v55, %v744_v52  ;;  %v974_v11 = vadd.f32 %v957_v41, %v857_v9  ;;  %v1195_v41 = vld [vmem:[%s3978_s4 + $0x90] sm:$0xff]  ;;  %v2487_v52 = vld [vmem:[%s3978_s4 + $0x168] sm:$0xff] }
  0xfb   : > { %v959_v45 = vpop.f32.mrf.mxu0  ;;  %1236 = vmatpush1.msra.mxu0 %v1195_v41  ;;  %v1187_v55 = vld [vmem:[%s3978_s4 + $0x50] sm:$0xff] }
  0xfc   : > { %v975_v12 = vadd.f32 %v959_v45, %v858_v7  ;;  %v1193_v45 = vld [vmem:[%s3978_s4 + $0x80] sm:$0xff]  ;;  %1237 = vmatprep.subr.mxu0 %v1194_v43  ;;  %v2481_v7 = vld [vmem:[%s3978_s4 + $0x138] sm:$0xff]  ;;  %v2480_v9 = vld [vmem:[%s3978_s4 + $0x130] sm:$0xff] }
  0xfd   : > { %v963_v50 = vpop.f32.mrf.mxu0  ;;  %1238 = vmatpush1.msra.mxu0 %v1193_v45 }
  0xfe   : > { %v976_v10 = vadd.f32 %v963_v50, %v859_v5  ;;  %v2488_v50 = vld [vmem:[%s3978_s4 + $0x170] sm:$0xff]  ;;  %1239 = vmatprep.subr.mxu0 %v1192_v47  ;;  %v2528_v47 = vld [vmem:[%s3978_s4 + $0x2a8] sm:$0xff] }
  0xff   : > { %v965_v56 = vpop.f32.mrf.mxu0  ;;  %1240 = vmatpush1.msra.mxu0 %v1191_v49  ;;  %v2527_v49 = vld [vmem:[%s3978_s4 + $0x2a0] sm:$0xff] }
 0x100   : > { %v977_v8 = vadd.f32 %v965_v56, %v860_v3  ;;  %1241 = vmatprep.subr.mxu0 %v1190_v51  ;;  %v1186_v56 = vld [vmem:[%s3978_s4 + $0x48] sm:$0xff]  ;;  %v1180_v3 = vld [vmem:[%s3978_s4 + $0x18] sm:$0xff] }
 0x101   : > { %v969_v61 = vpop.f32.mrf.mxu0  ;;  %1242 = vmatpush1.msra.mxu0 %v1189_v53 }
 0x102   : > { %v978_v6 = vadd.f32 %v969_v61, %v861_v1  ;;  %1243 = vmatprep.subr.mxu0 %v1188_v54  ;;  %v2485_v61 = vld [vmem:[%s3978_s4 + $0x158] sm:$0xff]  ;;  %v2483_v1 = vld [vmem:[%s3978_s4 + $0x148] sm:$0xff] }
 0x103   : > { %v971_v2 = vpop.f32.mrf.mxu0  ;;  %1244 = vmatpush1.msra.mxu0 %v1187_v55  ;;  %v2524_v54 = vld [vmem:[%s3978_s4 + $0x288] sm:$0xff]  ;;  %v2562_v55 = vld [vmem:[%s3978_s4 + $0x3b0] sm:$0xff] }
 0x104   : > { %v979_v4 = vadd.f32 %v971_v2, %v862_v63  ;;  %1245 = vmatprep.subr.mxu0 %v1186_v56  ;;  %v2484_v63 = vld [vmem:[%s3978_s4 + $0x150] sm:$0xff] }
 0x105   : > { %1246 = vmatpush1.msra.mxu0 %v1185_v57  ;;  %v2523_v57 = vld [vmem:[%s3978_s4 + $0x280] sm:$0xff] }
 0x106   : > { %1015 = vmatprep.subr.mxu1 %v979_v4  ;;  %1247 = vmatprep.subr.mxu0 %v1184_v58  ;;  %v2561_v58 = vld [vmem:[%s3978_s4 + $0x3a8] sm:$0xff] }
 0x107   : > { %1016 = vmatpush1.msra.mxu1 %v978_v6  ;;  %1248 = vmatpush1.msra.mxu0 %v1183_v60  ;;  %v2560_v60 = vld [vmem:[%s3978_s4 + $0x3a0] sm:$0xff] }
 0x108   : > { %1017 = vmatprep.subr.mxu1 %v977_v8  ;;  %1249 = vmatprep.subr.mxu0 %v1182_v62  ;;  %v2559_v62 = vld [vmem:[%s3978_s4 + $0x398] sm:$0xff] }
 0x109   : > { %1018 = vmatpush1.msra.mxu1 %v976_v10  ;;  %1250 = vmatpush1.msra.mxu0 %v1181_v0  ;;  %v2558_v0 = vld [vmem:[%s3978_s4 + $0x390] sm:$0xff] }
 0x10a   : > { %1019 = vmatprep.subr.mxu1 %v975_v12  ;;  %1251 = vmatprep.subr.mxu0 %v1180_v3  ;;  %v2518_v3 = vld [vmem:[%s3978_s4 + $0x258] sm:$0xff] }
 0x10b   : > { %1020 = vmatpush1.msra.mxu1 %v974_v11 }
 0x10c   : > { %2465 = vmatmul.mubr.msk.f32.vlgmr.msra.gmra.mxu1 %vm982_vm5, %v980_v13  ;;  %1101 = vmatprep.subr.mxu1 %v979_v4  ;;  %v2482_v4 = vld [vmem:[%s3978_s4 + $0x140] sm:$0xff] }
 0x10d   : > { %1102 = vmatpush1.msra.mxu1 %v978_v6  ;;  %1059 = vmatprep.mubr.f32.mxu1 %v2879_v15  ;;  %v1179_v6 = vld [vmem:[%s3978_s4 + $0x10] sm:$0xff]  ;;  %v2478_v13 = vld [vmem:[%s3978_s4 + $0x120] sm:$0xff] }
 0x10e   : > { %1103 = vmatprep.subr.mxu1 %v977_v8  ;;  %1252 = vmatpush1.msra.mxu0 %v1179_v6  ;;  %v1178_v8 = vld [vmem:[%s3978_s4 + $0x8] sm:$0xff]  ;;  %v2555_v6 = vld [vmem:[%s3978_s4 + $0x378] sm:$0xff] }
 0x10f   : > { %1104 = vmatpush1.msra.mxu1 %v976_v10  ;;  %1253 = vmatprep.subr.mxu0 %v1178_v8  ;;  %v2554_v8 = vld [vmem:[%s3978_s4 + $0x370] sm:$0xff] }
 0x110   : > { %2466 = vmatmul.mubr.msk.f32.gmra.mxu1 %vm982_vm5, %v981_v14  ;;  %1105 = vmatprep.subr.mxu1 %v975_v12  ;;  %v1177_v12 = vld [vmem:[%s3978_s4] sm:$0xff]  ;;  %v2532_v14 = vld [vmem:[%s3978_s4 + $0x2c8] sm:$0xff] }
 0x111   : > { %1106 = vmatpush1.msra.mxu1 %v974_v11  ;;  %1139 = vmatprep.mubr.f32.mxu1 %v2879_v15  ;;  %v2479_v11 = vld [vmem:[%s3978_s4 + $0x128] sm:$0xff] }
 0x112   : > { %1333 = vmatprep.subr.mxu1 %v2501_v23  ;;  %1254 = vmatpush1.msra.mxu0 %v1177_v12  ;;  %v2474_v23 = vld [vmem:[%s3978_s4 + $0x100] sm:$0xff]  ;;  %v2514_v12 = vld [vmem:[%s3978_s4 + $0x238] sm:$0xff] }
 0x113   : > { %1442 = vmatprep.subr.mxu0 %v2532_v14  ;;  %v2551_v14 = vld [vmem:[%s3978_s4 + $0x358] sm:$0xff] }
 0x114   : > { %2469 = vmatmul.mubr.msk.f32.vlgmr.msra.gmra.mxu1 %vm982_vm5, %v2467_v16 }
 0x115   : > { %1145 = vmatprep.mubr.f32.mxu1 %v2879_v15  ;;  %1334 = vmatpush1.msra.mxu1 %v2500_v26 }
 0x116   : > { %1335 = vmatprep.subr.mxu1 %v2499_v28 }
 0x117   : > { %1336 = vmatpush1.msra.mxu1 %v2498_v31 }
 0x118   : > { %2470 = vmatmul.mubr.msk.f32.gmra.mxu1 %vm982_vm5, %v2468_v17  ;;  %1337 = vmatprep.subr.mxu1 %v2497_v33  ;;  %v2477_v17 = vld [vmem:[%s3978_s4 + $0x118] sm:$0xff] }
 0x119   : > { %1395 = vmatprep.mubr.f32.mxu1 %v2879_v15  ;;  %1338 = vmatpush1.msra.mxu1 %v2496_v35 }
 0x11a   : > { %1339 = vmatprep.subr.mxu1 %v2495_v36 }
 0x11b   : > { %1340 = vmatpush1.msra.mxu1 %v2494_v38 }
 0x11c   : > { %1341 = vmatprep.subr.mxu1 %v2493_v40 }
 0x11d   : > { %1342 = vmatpush1.msra.mxu1 %v2492_v42  ;;  %v2531_v42 = vld [vmem:[%s3978_s4 + $0x2c0] sm:$0xff] }
 0x11e   : > { %1343 = vmatprep.subr.mxu1 %v2491_v44  ;;  %v2530_v44 = vld [vmem:[%s3978_s4 + $0x2b8] sm:$0xff] }
 0x11f   : > { %1344 = vmatpush1.msra.mxu1 %v2490_v46  ;;  %v2529_v46 = vld [vmem:[%s3978_s4 + $0x2b0] sm:$0xff] }
 0x120   : > { %1345 = vmatprep.subr.mxu1 %v2489_v48 }
 0x121   : > { %1346 = vmatpush1.msra.mxu1 %v2488_v50  ;;  %v2526_v50 = vld [vmem:[%s3978_s4 + $0x298] sm:$0xff] }
 0x122   : > { %1347 = vmatprep.subr.mxu1 %v2487_v52  ;;  %v2525_v52 = vld [vmem:[%s3978_s4 + $0x290] sm:$0xff] }
 0x123   : > { %1348 = vmatpush1.msra.mxu1 %v2486_v59  ;;  %v2522_v59 = vld [vmem:[%s3978_s4 + $0x278] sm:$0xff] }
 0x124   : > { %1349 = vmatprep.subr.mxu1 %v2485_v61  ;;  %v2521_v61 = vld [vmem:[%s3978_s4 + $0x270] sm:$0xff] }
 0x125   : > { %1350 = vmatpush1.msra.mxu1 %v2484_v63  ;;  %v2520_v63 = vld [vmem:[%s3978_s4 + $0x268] sm:$0xff] }
 0x126   : > { %1351 = vmatprep.subr.mxu1 %v2483_v1  ;;  %v2519_v1 = vld [vmem:[%s3978_s4 + $0x260] sm:$0xff] }
 0x127   : > { %1352 = vmatpush1.msra.mxu1 %v2482_v4  ;;  %v2556_v4 = vld [vmem:[%s3978_s4 + $0x380] sm:$0xff] }
 0x128   : > { %1353 = vmatprep.subr.mxu1 %v2481_v7  ;;  %v2516_v7 = vld [vmem:[%s3978_s4 + $0x248] sm:$0xff] }
 0x129   : > { %1354 = vmatpush1.msra.mxu1 %v2480_v9  ;;  %v2515_v9 = vld [vmem:[%s3978_s4 + $0x240] sm:$0xff] }
 0x12a   : > { %1355 = vmatprep.subr.mxu1 %v2479_v11  ;;  %v2552_v11 = vld [vmem:[%s3978_s4 + $0x360] sm:$0xff] }
 0x12b   : > { %1356 = vmatpush1.msra.mxu1 %v2478_v13  ;;  %v2513_v13 = vld [vmem:[%s3978_s4 + $0x230] sm:$0xff] }
 0x12c   : > { %1357 = vmatprep.subr.mxu1 %v2477_v17  ;;  %v2550_v17 = vld [vmem:[%s3978_s4 + $0x350] sm:$0xff] }
 0x12d   : > { %1358 = vmatpush1.msra.mxu1 %v2476_v19  ;;  %v2549_v19 = vld [vmem:[%s3978_s4 + $0x348] sm:$0xff] }
 0x12e   : > { %1359 = vmatprep.subr.mxu1 %v2475_v21  ;;  %v2548_v21 = vld [vmem:[%s3978_s4 + $0x340] sm:$0xff] }
 0x12f   : > { %1360 = vmatpush1.msra.mxu1 %v2474_v23  ;;  %v2547_v23 = vld [vmem:[%s3978_s4 + $0x338] sm:$0xff] }
 0x130   : > { %1361 = vmatprep.subr.mxu1 %v2473_v25  ;;  %v2508_v25 = vld [vmem:[%s3978_s4 + $0x208] sm:$0xff] }
 0x131   : > { %1362 = vmatpush1.msra.mxu1 %v2472_v27  ;;  %v2507_v27 = vld [vmem:[%s3978_s4 + $0x200] sm:$0xff] }
 0x132   : > { %1551 = vmatprep.subr.mxu1 %v2563_v32  ;;  %v2544_v32 = vld [vmem:[%s3978_s4 + $0x320] sm:$0xff] }
 0x1cc   : > { %v1055_v2 = vpop.f32.mrf.mxu1 }
 0x1ce   : > { %v1057_v5 = vpop.f32.mrf.mxu1 }
 0x1d0   : > { %v1061_v10 = vpop.f32.mrf.mxu1 }
 0x1d2   : > { %v1063_v16 = vpop.f32.mrf.mxu1 }
 0x1d4   : > { %v1141_v18 = vpop.f32.mrf.mxu1 }
 0x1d5   : > { %v1152_v20 = vmax.f32 %v1055_v2, %v1141_v18  ;;  %v2557_v2 = vld [vmem:[%s3978_s4 + $0x388] sm:$0xff]  ;;  %v2511_v18 = vld [vmem:[%s3978_s4 + $0x220] sm:$0xff] }
 0x1d6   : > { %v1143_v22 = vpop.f32.mrf.mxu1 }
 0x1d7   : > { %1160 = vrot.lane.b32.xlu0 %v1152_v20, %s2880_s24  ;;  %v1153_v28 = vmax.f32 %v1057_v5, %v1143_v22  ;;  %v2517_v5 = vld [vmem:[%s3978_s4 + $0x250] sm:$0xff] }
 0x1d8   : > { %v1147_v26 = vpop.f32.mrf.mxu1  ;;  %v2509_v22 = vld [vmem:[%s3978_s4 + $0x210] sm:$0xff] }
 0x1d9   : > { %v1154_v31 = vmax.f32 %v1061_v10, %v1147_v26  ;;  %v2553_v10 = vld [vmem:[%s3978_s4 + $0x368] sm:$0xff]  ;;  %v2546_v26 = vld [vmem:[%s3978_s4 + $0x330] sm:$0xff] }
 0x1da   : > { %v1149_v33 = vpop.f32.mrf.mxu1 }
 0x1db   : > { %1162 = vrot.lane.b32.xlu0 %v1153_v28, %s2880_s24  ;;  %1164 = vrot.lane.b32.xlu1 %v1154_v31, %s2880_s24  ;;  %v1155_v34 = vmax.f32 %v1063_v16, %v1149_v33  ;;  %v2512_v16 = vld [vmem:[%s3978_s4 + $0x228] sm:$0xff]  ;;  %v2505_v33 = vld [vmem:[%s3978_s4 + $0x1f0] sm:$0xff] }
 0x1dc   : > { %v2545_v28 = vld [vmem:[%s3978_s4 + $0x328] sm:$0xff] }
 0x1df   : > { %1166 = vrot.lane.b32.xlu1 %v1155_v34, %s2880_s24  ;;  %v2543_v34 = vld [vmem:[%s3978_s4 + $0x318] sm:$0xff]  ;;  %s2883_s24 = smov [#allocation2]  }
 0x1e0   : > { %s2821_s15 = sshll.u32 %s2883_s24, 4  ;;  %s2822_s15 = int_to_ptr.vmem [resolvable:$false] %s2821_s15 }
 0x1e1   : > { %s2823_s21 = scalar_lea.vmem %s2822_s15, 32  ;;  %p2824_p0 = scmp.lt.s32.totalorder %s2348_s29, %s2822_s15 }
 0x1e2   : > { %p2825_p1 = scmp.lt.s32.totalorder %s2823_s21, %s2817_s22 }
 0x1e4   : > { %p2826_p2 = por %p2825_p1, %p2824_p0 }
 0x1e6   : > { %p2827_p3 = pnand %p2826_p2, %p2820_p13 }
 0x249   : > { %v1161_v35 = vpop.permute.xlu0 %1160 }
 0x24d   : > { %v1163_v36 = vpop.permute.xlu0 %1162  ;;  %v1165_v37 = vpop.permute.xlu1 %1164 }
 0x24e   : > { %v1169_v38 = vsel %vm1168_vm6, %v1161_v35, %v1163_v36  ;;  %v2504_v35 = vld [vmem:[%s3978_s4 + $0x1e8] sm:$0xff]  ;;  %v2542_v36 = vld [vmem:[%s3978_s4 + $0x310] sm:$0xff] }
 0x24f   : > { %v1173_v39 = vmax.f32 %v1152_v20, %v1169_v38  ;;  %v2510_v20 = vld [vmem:[%s3978_s4 + $0x218] sm:$0xff]  ;;  %v2503_v38 = vld [vmem:[%s3978_s4 + $0x1e0] sm:$0xff] }
 0x251   : > { %v3416_v40 = vmax.f32 %v1173_v39, 0.0  ;;  %v1167_v41 = vpop.permute.xlu1 %1166  ;;  %v2541_v39 = vld [vmem:[%s3978_s4 + $0x308] sm:$0xff] }
 0x252   : > { %v1170_v43 = vsel %vm1168_vm6, %v1165_v37, %v1167_v41 }
 0x253   : > { %v1174_v45 = vmax.f32 %v1154_v31, %v1170_v43  ;;  %2471 = vmatmul.mubr.msk.f32.vlgmr.msra.gmra.mxu0 %vm1219_vm7, %v3416_v40  ;;  %v1326_v53 = vrot.slane %v3416_v40, 1  ;;  %v2506_v31 = vld [vmem:[%s3978_s4 + $0x1f8] sm:$0xff]  ;;  %v1435_v41 = vrot.slane %v3416_v40, 2  ;;  %v2594_v43 = vld [vmem:[%s3978_s4 + $0x4a8] sm:$0xff] }
 0x254   : > { %1443 = vmatpush1.msra.mxu0 %v2531_v42  ;;  %1504 = vmatprep.mubr.f32.mxu0 %v2879_v15  ;;  %v2540_v42 = vld [vmem:[%s3978_s4 + $0x300] sm:$0xff] }
 0x255   : > { %v3434_v48 = vmax.f32 %v1174_v45, 0.0  ;;  %1444 = vmatprep.subr.mxu0 %v2530_v44  ;;  %v2539_v44 = vld [vmem:[%s3978_s4 + $0x2f8] sm:$0xff] }
 0x256   : > { %1445 = vmatpush1.msra.mxu0 %v2529_v46  ;;  %v2593_v46 = vld [vmem:[%s3978_s4 + $0x4a0] sm:$0xff] }
 0x257   : > { %v1327_v51 = vrot.slane %v3434_v48, 1  ;;  %1446 = vmatprep.subr.mxu0 %v2528_v47  ;;  %v1436_v37 = vrot.slane %v3434_v48, 2  ;;  %v2538_v47 = vld [vmem:[%s3978_s4 + $0x2f0] sm:$0xff] }
 0x258   : > { %1447 = vmatpush1.msra.mxu0 %v2527_v49  ;;  %v2592_v49 = vld [vmem:[%s3978_s4 + $0x498] sm:$0xff] }
 0x259   : > { %1448 = vmatprep.subr.mxu0 %v2526_v50  ;;  %v1328_v56 = vsel %vm518_vm2, %v1326_v53, %v1327_v51  ;;  %v1437_v45 = vsel %vm636_vm3, %v1435_v41, %v1436_v37  ;;  %v2537_v50 = vld [vmem:[%s3978_s4 + $0x2e8] sm:$0xff]  ;;  %v2591_v51 = vld [vmem:[%s3978_s4 + $0x490] sm:$0xff] }
 0x25a   : > { %1449 = vmatpush1.msra.mxu0 %v2525_v52  ;;  %2502 = vmatmul.mubr.msk.f32.vlgmr.msra.gmra.mxu1 %vm1219_vm7, %v1328_v56  ;;  %v2536_v52 = vld [vmem:[%s3978_s4 + $0x2e0] sm:$0xff]  ;;  %v2590_v53 = vld [vmem:[%s3978_s4 + $0x488] sm:$0xff]  ;;  %v2534_v56 = vld [vmem:[%s3978_s4 + $0x2d0] sm:$0xff] }
 0x25b   : > { %1450 = vmatprep.subr.mxu0 %v2524_v54  ;;  %1552 = vmatpush1.msra.mxu1 %v2562_v55  ;;  %v2535_v54 = vld [vmem:[%s3978_s4 + $0x2d8] sm:$0xff]  ;;  %v2589_v55 = vld [vmem:[%s3978_s4 + $0x480] sm:$0xff] }
 0x25c   : > { %1451 = vmatpush1.msra.mxu0 %v2523_v57  ;;  %1553 = vmatprep.subr.mxu1 %v2561_v58  ;;  %v1545_v57 = vrot.slane %v3434_v48, 3  ;;  %v2588_v58 = vld [vmem:[%s3978_s4 + $0x478] sm:$0xff] }
 0x25d   : > { %1452 = vmatprep.subr.mxu0 %v2522_v59  ;;  %1554 = vmatpush1.msra.mxu1 %v2560_v60  ;;  %v1544_v59 = vrot.slane %v3416_v40, 3  ;;  %v2587_v60 = vld [vmem:[%s3978_s4 + $0x470] sm:$0xff] }
 0x25e   : > { %1453 = vmatpush1.msra.mxu0 %v2521_v61  ;;  %1555 = vmatprep.subr.mxu1 %v2559_v62  ;;  %v2586_v61 = vld [vmem:[%s3978_s4 + $0x468] sm:$0xff] }
 0x25f   : > { %1454 = vmatprep.subr.mxu0 %v2520_v63  ;;  %1556 = vmatpush1.msra.mxu1 %v2558_v0  ;;  %v1546_v62 = vsel %vm754_vm4, %v1544_v59, %v1545_v57  ;;  %v2585_v63 = vld [vmem:[%s3978_s4 + $0x460] sm:$0xff]  ;;  %v2584_v0 = vld [vmem:[%s3978_s4 + $0x458] sm:$0xff]  ;;  %v1900_v57 = vld [vmem:[%s3981_s7 + $0x28] sm:$0xff] }
 0x260   : > { %1455 = vmatpush1.msra.mxu0 %v2519_v1  ;;  %1557 = vmatprep.subr.mxu1 %v2557_v2  ;;  %v2583_v1 = vld [vmem:[%s3978_s4 + $0x450] sm:$0xff]  ;;  %v2582_v2 = vld [vmem:[%s3978_s4 + $0x448] sm:$0xff]  ;;  %v1899_v59 = vld [vmem:[%s3981_s7 + $0x20] sm:$0xff] }
 0x261   : > { %1456 = vmatprep.subr.mxu0 %v2518_v3  ;;  %1558 = vmatpush1.msra.mxu1 %v2556_v4  ;;  %v2581_v3 = vld [vmem:[%s3978_s4 + $0x440] sm:$0xff]  ;;  %v2580_v4 = vld [vmem:[%s3978_s4 + $0x438] sm:$0xff] }
 0x262   : > { %1457 = vmatpush1.msra.mxu0 %v2517_v5  ;;  %1559 = vmatprep.subr.mxu1 %v2555_v6  ;;  %v2579_v5 = vld [vmem:[%s3978_s4 + $0x430] sm:$0xff]  ;;  %v2578_v6 = vld [vmem:[%s3978_s4 + $0x428] sm:$0xff] }
 0x263   : > { %1458 = vmatprep.subr.mxu0 %v2516_v7  ;;  %1560 = vmatpush1.msra.mxu1 %v2554_v8  ;;  %v2577_v7 = vld [vmem:[%s3978_s4 + $0x420] sm:$0xff]  ;;  %v2576_v8 = vld [vmem:[%s3978_s4 + $0x418] sm:$0xff] }
 0x264   : > { %1459 = vmatpush1.msra.mxu0 %v2515_v9  ;;  %1561 = vmatprep.subr.mxu1 %v2553_v10  ;;  %v2575_v9 = vld [vmem:[%s3978_s4 + $0x410] sm:$0xff]  ;;  %v2574_v10 = vld [vmem:[%s3978_s4 + $0x408] sm:$0xff] }
 0x265   : > { %1460 = vmatprep.subr.mxu0 %v2514_v12  ;;  %1562 = vmatpush1.msra.mxu1 %v2552_v11  ;;  %v2573_v12 = vld [vmem:[%s3978_s4 + $0x400] sm:$0xff]  ;;  %v2572_v11 = vld [vmem:[%s3978_s4 + $0x3f8] sm:$0xff] }
 0x266   : > { %1461 = vmatpush1.msra.mxu0 %v2513_v13  ;;  %1563 = vmatprep.subr.mxu1 %v2551_v14  ;;  %v2571_v13 = vld [vmem:[%s3978_s4 + $0x3f0] sm:$0xff]  ;;  %v2570_v14 = vld [vmem:[%s3978_s4 + $0x3e8] sm:$0xff] }
 0x267   : > { %1462 = vmatprep.subr.mxu0 %v2512_v16  ;;  %1564 = vmatpush1.msra.mxu1 %v2550_v17  ;;  %v2569_v16 = vld [vmem:[%s3978_s4 + $0x3e0] sm:$0xff]  ;;  %v2568_v17 = vld [vmem:[%s3978_s4 + $0x3d8] sm:$0xff] }
 0x268   : > { %1463 = vmatpush1.msra.mxu0 %v2511_v18  ;;  %1565 = vmatprep.subr.mxu1 %v2549_v19  ;;  %v2567_v18 = vld [vmem:[%s3978_s4 + $0x3d0] sm:$0xff]  ;;  %v2566_v19 = vld [vmem:[%s3978_s4 + $0x3c8] sm:$0xff] }
 0x269   : > { %1464 = vmatprep.subr.mxu0 %v2510_v20  ;;  %1566 = vmatpush1.msra.mxu1 %v2548_v21  ;;  %v1654_v20 = vrot.slane %v3434_v48, 4  ;;  %v2565_v21 = vld [vmem:[%s3978_s4 + $0x3c0] sm:$0xff] }
 0x26a   : > { %1465 = vmatpush1.msra.mxu0 %v2509_v22  ;;  %1567 = vmatprep.subr.mxu1 %v2547_v23  ;;  %v1653_v22 = vrot.slane %v3416_v40, 4  ;;  %v1207_v48 = vld [vmem:[%s3979_s5] sm:$0x3] }
 0x26b   : > { %1466 = vmatprep.subr.mxu0 %v2508_v25  ;;  %1568 = vmatpush1.msra.mxu1 %v2546_v26  ;;  %v1212_v40 = vrot.slane %v1207_v48, %v400_v30  ;;  %v2597_v30 = vld [vmem:[%s3980_s6 + $0x4] sm:$0xf] }
 0x26c   : > { %1467 = vmatpush1.msra.mxu0 %v2507_v27  ;;  %1569 = vmatprep.subr.mxu1 %v2545_v28  ;;  %v1655_v23 = vsel %vm418_vm0, %v1653_v22, %v1654_v20  ;;  %v1216_v28 = vrot.slane %v1207_v48, %v404_v29  ;;  %v1934_v20 = vld [vmem:[%s3981_s7 + $0x138] sm:$0xff]  ;;  %v1933_v22 = vld [vmem:[%s3981_s7 + $0x130] sm:$0xff]  ;;  %v1931_v48 = vld [vmem:[%s3981_s7 + $0x120] sm:$0xff] }
 0x26d   : > { %1468 = vmatprep.subr.mxu0 %v2506_v31  ;;  %1570 = vmatpush1.msra.mxu1 %v2544_v32 }
 0x26e   : > { %1469 = vmatpush1.msra.mxu0 %v2505_v33  ;;  %1571 = vmatprep.subr.mxu1 %v2543_v34 }
 0x26f   : > { %1470 = vmatprep.subr.mxu0 %v2504_v35  ;;  %1572 = vmatpush1.msra.mxu1 %v2542_v36 }
 0x270   : > { %1471 = vmatpush1.msra.mxu0 %v2503_v38  ;;  %1573 = vmatprep.subr.mxu1 %v2541_v39 }
 0x271   : > { %2533 = vmatmul.mubr.msk.f32.vlgmr.msra.gmra.mxu0 %vm1219_vm7, %v1437_v45  ;;  %1574 = vmatpush1.msra.mxu1 %v2540_v42 }
 0x272   : > { %1660 = vmatprep.subr.mxu0 %v2594_v43  ;;  %1575 = vmatprep.subr.mxu1 %v2539_v44 }
 0x273   : > { %1661 = vmatpush1.msra.mxu0 %v2593_v46  ;;  %1576 = vmatpush1.msra.mxu1 %v2538_v47 }
 0x274   : > { %1662 = vmatprep.subr.mxu0 %v2592_v49  ;;  %1577 = vmatprep.subr.mxu1 %v2537_v50  ;;  %v1904_v49 = vld [vmem:[%s3981_s7 + $0x48] sm:$0xff]  ;;  %v1903_v50 = vld [vmem:[%s3981_s7 + $0x40] sm:$0xff] }
 0x275   : > { %1663 = vmatpush1.msra.mxu0 %v2591_v51  ;;  %1578 = vmatpush1.msra.mxu1 %v2536_v52  ;;  %v1914_v51 = vld [vmem:[%s3981_s7 + $0x98] sm:$0xff]  ;;  %v1913_v52 = vld [vmem:[%s3981_s7 + $0x90] sm:$0xff] }
 0x276   : > { %1664 = vmatprep.subr.mxu0 %v2590_v53  ;;  %1579 = vmatprep.subr.mxu1 %v2535_v54  ;;  %v1902_v53 = vld [vmem:[%s3981_s7 + $0x38] sm:$0xff]  ;;  %v1912_v54 = vld [vmem:[%s3981_s7 + $0x88] sm:$0xff] }
 0x277   : > { %1665 = vmatpush1.msra.mxu0 %v2589_v55  ;;  %1580 = vmatpush1.msra.mxu1 %v2534_v56  ;;  %v1901_v55 = vld [vmem:[%s3981_s7 + $0x30] sm:$0xff]  ;;  %v1911_v56 = vld [vmem:[%s3981_s7 + $0x80] sm:$0xff] }
 0x278   : > { %1613 = vmatprep.mubr.f32.mxu1 %v2879_v15  ;;  %1666 = vmatprep.subr.mxu0 %v2588_v58  ;;  %v1910_v58 = vld [vmem:[%s3981_s7 + $0x78] sm:$0xff] }
 0x279   : > { %2564 = vmatmul.mubr.msk.f32.vlgmr.msra.gmra.mxu1 %vm1219_vm7, %v1546_v62  ;;  %1667 = vmatpush1.msra.mxu0 %v2587_v60  ;;  %v1909_v60 = vld [vmem:[%s3981_s7 + $0x70] sm:$0xff]  ;;  %v1908_v62 = vld [vmem:[%s3981_s7 + $0x68] sm:$0xff] }
 0x27a   : > { %1668 = vmatprep.subr.mxu0 %v2586_v61  ;;  %1722 = vmatprep.mubr.f32.mxu0 %v2879_v15  ;;  %v1898_v61 = vld [vmem:[%s3981_s7 + $0x18] sm:$0xff] }
 0x27b   : > { %1669 = vmatpush1.msra.mxu0 %v2585_v63  ;;  %1799 = vmatprep.mubr.f32.mxu1 %v2879_v15  ;;  %v1897_v63 = vld [vmem:[%s3981_s7 + $0x10] sm:$0xff] }
 0x27c   : > { %1670 = vmatprep.subr.mxu0 %v2584_v0  ;;  %v1896_v0 = vld [vmem:[%s3981_s7 + $0x8] sm:$0xff] }
 0x27d   : > { %1671 = vmatpush1.msra.mxu0 %v2583_v1  ;;  %v1907_v1 = vld [vmem:[%s3981_s7 + $0x60] sm:$0xff] }
 0x27e   : > { %1672 = vmatprep.subr.mxu0 %v2582_v2  ;;  %v1895_v2 = vld [vmem:[%s3981_s7] sm:$0xff] }
 0x27f   : > { %1673 = vmatpush1.msra.mxu0 %v2581_v3  ;;  %v1906_v3 = vld [vmem:[%s3981_s7 + $0x58] sm:$0xff] }
 0x280   : > { %1674 = vmatprep.subr.mxu0 %v2580_v4 }
 0x281   : > { %1675 = vmatpush1.msra.mxu0 %v2579_v5  ;;  %v1905_v5 = vld [vmem:[%s3981_s7 + $0x50] sm:$0xff] }
 0x282   : > { %1676 = vmatprep.subr.mxu0 %v2578_v6 }
 0x283   : > { %1677 = vmatpush1.msra.mxu0 %v2577_v7 }
 0x284   : > { %1678 = vmatprep.subr.mxu0 %v2576_v8 }
 0x285   : > { %1679 = vmatpush1.msra.mxu0 %v2575_v9 }
 0x286   : > { %1680 = vmatprep.subr.mxu0 %v2574_v10 }
 0x287   : > { %1681 = vmatpush1.msra.mxu0 %v2573_v12 }
 0x288   : > { %1682 = vmatprep.subr.mxu0 %v2572_v11 }
 0x289   : > { %1683 = vmatpush1.msra.mxu0 %v2571_v13 }
 0x28a   : > { %1684 = vmatprep.subr.mxu0 %v2570_v14 }
 0x28b   : > { %1685 = vmatpush1.msra.mxu0 %v2569_v16 }
 0x28c   : > { %1686 = vmatprep.subr.mxu0 %v2568_v17  ;;  %v1924_v17 = vld [vmem:[%s3981_s7 + $0xe8] sm:$0xff] }
 0x28d   : > { %1687 = vmatpush1.msra.mxu0 %v2567_v18 }
 0x28e   : > { %1688 = vmatprep.subr.mxu0 %v2566_v19  ;;  %v1923_v19 = vld [vmem:[%s3981_s7 + $0xe0] sm:$0xff] }
 0x28f   : > { %1689 = vmatpush1.msra.mxu0 %v2565_v21  ;;  %v1922_v21 = vld [vmem:[%s3981_s7 + $0xd8] sm:$0xff] }
 0x290   : > { %2595 = vmatmul.mubr.msk.f32.vlgmr.msra.gmra.mxu0 %vm1219_vm7, %v1655_v23  ;;  %2684 = vmatprep.subr.mxu0 %v2879_v15  ;;  %v1921_v23 = vld [vmem:[%s3981_s7 + $0xd0] sm:$0xff] }
 0x291   : > { %2685 = vmatpush3.msra.mxu0 %v1914_v51  ;;  %2704 = vmatprep.mubr.msk.f32.mxu0 %vm2881_vm8, %v2879_v15  ;;  %v1935_v51 = vld [vmem:[%s3982_s8] sm:$0x1] }
 0x292   : > { %2686 = vmatprep.subr.mxu0 %v2879_v15 }
 0x293   : > { %2687 = vmatpush3.msra.mxu0 %v1913_v52 }
 0x294   : > { %2688 = vmatprep.subr.mxu0 %v2879_v15 }
 0x295   : > { %2689 = vmatpush3.msra.mxu0 %v1912_v54 }
 0x296   : > { %2690 = vmatprep.subr.mxu0 %v2879_v15 }
 0x297   : > { %2691 = vmatpush3.msra.mxu0 %v1911_v56 }
 0x298   : > { %2692 = vmatprep.subr.mxu0 %v2879_v15 }
 0x299   : > { %2693 = vmatpush3.msra.mxu0 %v1910_v58 }
 0x29a   : > { %2694 = vmatprep.subr.mxu0 %v2879_v15 }
 0x29b   : > { %2695 = vmatpush3.msra.mxu0 %v1909_v60  ;;  %v2241_v60 = vld [vmem:[%s3984_s10] sm:$0x1] }
 0x29c   : > { %2696 = vmatprep.subr.mxu0 %v2879_v15 }
 0x29d   : > { %2697 = vmatpush3.msra.mxu0 %v1908_v62 }
 0x29e   : > { %2698 = vmatprep.subr.mxu0 %v2879_v15 }
 0x29f   : > { %2699 = vmatpush3.msra.mxu0 %v1907_v1 }
 0x2a0   : > { %2700 = vmatprep.subr.mxu0 %v2879_v15 }
 0x2a1   : > { %2701 = vmatpush3.msra.mxu0 %v1906_v3 }
 0x2a2   : > { %2702 = vmatprep.subr.mxu0 %v2879_v15 }
 0x2a3   : > { %2703 = vmatpush3.msra.mxu0 %v1905_v5 }
 0x2a4   : > { %2730 = vmatprep.subr.mxu0 %v2879_v15 }
 0x313   : > { %v1289_v25 = vpop.f32.mrf.mxu0 }
 0x314   : > { %v1290_v35 = vadd.f32 %v1289_v25, %v1212_v40  ;;  %v1932_v25 = vld [vmem:[%s3981_s7 + $0x128] sm:$0xff]  ;;  %v1918_v40 = vld [vmem:[%s3981_s7 + $0xb8] sm:$0xff] }
 0x315   : > { %v1291_v27 = vpop.f32.mrf.mxu0 }
 0x316   : > { %v1292_v34 = vadd.f32 %v1291_v27, %v1216_v28  ;;  %v1919_v27 = vld [vmem:[%s3981_s7 + $0xc0] sm:$0xff]  ;;  %v1930_v28 = vld [vmem:[%s3981_s7 + $0x118] sm:$0xff] }
 0x31a   : > { %v1397_v26 = vpop.f32.mrf.mxu1 }
 0x31b   : > { %v1402_v38 = vadd.f32 %v1397_v26, %v1290_v35  ;;  %v1920_v26 = vld [vmem:[%s3981_s7 + $0xc8] sm:$0xff]  ;;  %v1927_v35 = vld [vmem:[%s3981_s7 + $0x100] sm:$0xff] }
 0x31c   : > { %v1399_v31 = vpop.f32.mrf.mxu1 }
 0x31d   : > { %v1403_v37 = vadd.f32 %v1399_v31, %v1292_v34  ;;  %v1929_v31 = vld [vmem:[%s3981_s7 + $0x110] sm:$0xff]  ;;  %v1916_v34 = vld [vmem:[%s3981_s7 + $0xa8] sm:$0xff] }
 0x331   : > { %v1506_v32 = vpop.f32.mrf.mxu0 }
 0x332   : > { %v1511_v42 = vadd.f32 %v1506_v32, %v1402_v38  ;;  %v1917_v32 = vld [vmem:[%s3981_s7 + $0xb0] sm:$0xff] }
 0x333   : > { %v1508_v36 = vpop.f32.mrf.mxu0 }
 0x334   : > { %v1512_v41 = vadd.f32 %v1508_v36, %v1403_v37  ;;  %v1915_v36 = vld [vmem:[%s3981_s7 + $0xa0] sm:$0xff]  ;;  %v1926_v37 = vld [vmem:[%s3981_s7 + $0xf8] sm:$0xff] }
 0x339   : > { %v1615_v33 = vpop.f32.mrf.mxu1 }
 0x33a   : > { %v1620_v45 = vadd.f32 %v1615_v33, %v1511_v42  ;;  %v1928_v33 = vld [vmem:[%s3981_s7 + $0x108] sm:$0xff]  ;;  %v2240_v42 = vld [vmem:[%s3983_s9 + $0x30] sm:$0x3] }
 0x33b   : > { %v1617_v39 = vpop.f32.mrf.mxu1 }
 0x33c   : > { %v1621_v44 = vadd.f32 %v1617_v39, %v1512_v41  ;;  %v1925_v39 = vld [vmem:[%s3981_s7 + $0xf0] sm:$0xff] }
 0x350   : > { %v1724_v43 = vpop.f32.mrf.mxu0 }
 0x351   : > { %v1729_v29 = vadd.f32 %v1724_v43, %v1620_v45  ;;  %v2239_v43 = vld [vmem:[%s3983_s9 + $0x28] sm:$0xff]  ;;  %v2237_v45 = vld [vmem:[%s3983_s9 + $0x18] sm:$0xff] }
 0x352   : > { %v1726_v46 = vpop.f32.mrf.mxu0 }
 0x353   : > { %v1730_v47 = vadd.f32 %v1726_v46, %v1621_v44  ;;  %v2238_v44 = vld [vmem:[%s3983_s9 + $0x20] sm:$0xff]  ;;  %v2236_v46 = vld [vmem:[%s3983_s9 + $0x10] sm:$0xff] }
 0x355   : > { %1765 = vmatprep.subr.mxu1 %v1730_v47 }
 0x356   : > { %1766 = vmatpush1.msra.mxu1 %v1729_v29 }
 0x357   : > { %2596 = vmatmul.mubr.msk.f32.vlgmr.msra.gmra.mxu1 %vm1168_vm6, %v1731_v24  ;;  %1841 = vmatprep.subr.mxu1 %v1730_v47  ;;  %v2235_v47 = vld [vmem:[%s3983_s9 + $0x8] sm:$0xff] }
 0x358   : > { %1842 = vmatpush1.msra.mxu1 %v1729_v29  ;;  %1875 = vmatprep.mubr.f32.mxu1 %v2879_v15  ;;  %v2234_v29 = vld [vmem:[%s3983_s9] sm:$0xff] }
 0x359   : > { %2661 = vmatprep.subr.mxu1 %v2879_v15 }
 0x35b   : > { %2598 = vmatmul.mubr.msk.f32.vlgmr.msra.gmra.mxu1 %vm1168_vm6, %v2597_v30 }
 0x35c   : > { %2662 = vmatpush3.msra.mxu1 %v1904_v49  ;;  %2681 = vmatprep.mubr.msk.f32.mxu1 %vm2881_vm8, %v2879_v15 }
 0x35d   : > { %2663 = vmatprep.subr.mxu1 %v2879_v15 }
 0x35e   : > { %2664 = vmatpush3.msra.mxu1 %v1903_v50 }
 0x35f   : > { %2665 = vmatprep.subr.mxu1 %v2879_v15 }
 0x360   : > { %2666 = vmatpush3.msra.mxu1 %v1902_v53 }
 0x361   : > { %2667 = vmatprep.subr.mxu1 %v2879_v15 }
 0x362   : > { %2668 = vmatpush3.msra.mxu1 %v1901_v55 }
 0x363   : > { %2669 = vmatprep.subr.mxu1 %v2879_v15 }
 0x364   : > { %2670 = vmatpush3.msra.mxu1 %v1900_v57 }
 0x365   : > { %2671 = vmatprep.subr.mxu1 %v2879_v15 }
 0x366   : > { %2672 = vmatpush3.msra.mxu1 %v1899_v59 }
 0x367   : > { %2673 = vmatprep.subr.mxu1 %v2879_v15 }
 0x368   : > { %2674 = vmatpush3.msra.mxu1 %v1898_v61 }
 0x369   : > { %2675 = vmatprep.subr.mxu1 %v2879_v15 }
 0x36a   : > { %2676 = vmatpush3.msra.mxu1 %v1897_v63 }
 0x36b   : > { %2677 = vmatprep.subr.mxu1 %v2879_v15 }
 0x36c   : > { %2678 = vmatpush3.msra.mxu1 %v1896_v0 }
 0x36d   : > { %2679 = vmatprep.subr.mxu1 %v2879_v15 }
 0x36e   : > { %2680 = vmatpush3.msra.mxu1 %v1895_v2 }
 0x36f   : > { %2707 = vmatprep.subr.mxu1 %v2879_v15 }
 0x417   : > { %v1801_v4 = vpop.f32.mrf.mxu1 }
 0x419   : > { %v1803_v6 = vpop.f32.mrf.mxu1 }
 0x41b   : > { %v1877_v7 = vpop.f32.mrf.mxu1 }
 0x41c   : > { %v1882_v8 = vmax.f32 %v1801_v4, %v1877_v7 }
 0x41d   : > { %v1879_v9 = vpop.f32.mrf.mxu1 }
 0x41e   : > { %v1883_v10 = vmax.f32 %v1803_v6, %v1879_v9  ;;  %1886 = vrot.lane.b32.xlu0 %v1882_v8, %s2882_s16 }
 0x420   : > { %1888 = vrot.lane.b32.xlu1 %v1883_v10, %s2882_s16  ;;  %s2335_s16 = scalar_lea.sflag [#allocation3], %s377_s26 }
 0x490   : > { %v1887_v12 = vpop.permute.xlu0 %1886 }
 0x492   : > { %v1889_v11 = vpop.permute.xlu1 %1888 }
 0x493   : > { %v1891_v13 = vsel %vm1890_vm9, %v1887_v12, %v1889_v11 }
 0x494   : > { %v1893_v14 = vmax.f32 %v1882_v8, %v1891_v13 }
 0x496   : > { %v3809_v16 = vmax.f32 %v1893_v14, 0.0 }
 0x498   : > { %v2011_v18 = vrot.slane %v3809_v16, 1  ;;  %2682 = vmatmul.mubr.msk.f32.vlgmr.msra.gmra.mxu1 %vm1936_vm10, %v3809_v16  ;;  %v2085_v38 = vrot.slane %v3809_v16, 2  ;;  %v2159_v41 = vrot.slane %v3809_v16, 3 }
 0x499   : > { %2708 = vmatpush3.msra.mxu1 %v1924_v17  ;;  %2727 = vmatprep.mubr.msk.f32.mxu1 %vm2881_vm8, %v2879_v15 }
 0x49a   : > { %2709 = vmatprep.subr.mxu1 %v2879_v15  ;;  %2705 = vmatmul.mubr.msk.f32.vlgmr.msra.gmra.mxu0 %vm1936_vm10, %v2011_v18 }
 0x49b   : > { %2710 = vmatpush3.msra.mxu1 %v1923_v19  ;;  %2731 = vmatpush3.msra.mxu0 %v1934_v20 }
 0x49c   : > { %2711 = vmatprep.subr.mxu1 %v2879_v15  ;;  %2732 = vmatprep.subr.mxu0 %v2879_v15 }
 0x49d   : > { %2712 = vmatpush3.msra.mxu1 %v1922_v21  ;;  %2733 = vmatpush3.msra.mxu0 %v1933_v22 }
 0x49e   : > { %2713 = vmatprep.subr.mxu1 %v2879_v15  ;;  %2734 = vmatprep.subr.mxu0 %v2879_v15 }
 0x49f   : > { %2714 = vmatpush3.msra.mxu1 %v1921_v23  ;;  %2735 = vmatpush3.msra.mxu0 %v1932_v25 }
 0x4a0   : > { %2715 = vmatprep.subr.mxu1 %v2879_v15  ;;  %2736 = vmatprep.subr.mxu0 %v2879_v15 }
 0x4a1   : > { %2716 = vmatpush3.msra.mxu1 %v1920_v26  ;;  %2737 = vmatpush3.msra.mxu0 %v1931_v48 }
 0x4a2   : > { %2717 = vmatprep.subr.mxu1 %v2879_v15  ;;  %2738 = vmatprep.subr.mxu0 %v2879_v15 }
 0x4a3   : > { %2718 = vmatpush3.msra.mxu1 %v1919_v27  ;;  %2739 = vmatpush3.msra.mxu0 %v1930_v28 }
 0x4a4   : > { %2719 = vmatprep.subr.mxu1 %v2879_v15  ;;  %2740 = vmatprep.subr.mxu0 %v2879_v15 }
 0x4a5   : > { %2720 = vmatpush3.msra.mxu1 %v1918_v40  ;;  %2741 = vmatpush3.msra.mxu0 %v1929_v31 }
 0x4a6   : > { %2721 = vmatprep.subr.mxu1 %v2879_v15  ;;  %2742 = vmatprep.subr.mxu0 %v2879_v15 }
 0x4a7   : > { %2722 = vmatpush3.msra.mxu1 %v1917_v32  ;;  %2743 = vmatpush3.msra.mxu0 %v1928_v33 }
 0x4a8   : > { %2723 = vmatprep.subr.mxu1 %v2879_v15  ;;  %2744 = vmatprep.subr.mxu0 %v2879_v15 }
 0x4a9   : > { %2724 = vmatpush3.msra.mxu1 %v1916_v34  ;;  %2745 = vmatpush3.msra.mxu0 %v1927_v35 }
 0x4aa   : > { %2725 = vmatprep.subr.mxu1 %v2879_v15  ;;  %2746 = vmatprep.subr.mxu0 %v2879_v15 }
 0x4ab   : > { %2726 = vmatpush3.msra.mxu1 %v1915_v36  ;;  %2747 = vmatpush3.msra.mxu0 %v1926_v37 }
 0x4ac   : > { %2728 = vmatmul.mubr.msk.f32.vlgmr.msra.gmra.mxu1 %vm1936_vm10, %v2085_v38  ;;  %2748 = vmatprep.subr.mxu0 %v2879_v15 }
 0x4ad   : > { %2749 = vmatpush3.msra.mxu0 %v1925_v39  ;;  %2750 = vmatprep.mubr.msk.f32.mxu0 %vm2881_vm8, %v2879_v15 }
 0x4ae   : > { %2751 = vmatmul.mubr.msk.f32.vlgmr.msra.gmra.mxu0 %vm1936_vm10, %v2159_v41  ;;  %2753 = vmatprep.subr.mxu1 %v2879_v15 }
 0x4af   : > { %2767 = vmatprep.mubr.msk.f32.mxu1 %vm2881_vm8, %v2879_v15  ;;  %2754 = vmatpush3.msk.msra.mxu1 %vm2246_vm11, %v2240_v42 }
 0x4b0   : > { %2755 = vmatprep.subr.mxu1 %v2879_v15 }
 0x4b1   : > { %2756 = vmatpush3.msra.mxu1 %v2239_v43 }
 0x4b2   : > { %2757 = vmatprep.subr.mxu1 %v2879_v15 }
 0x4b3   : > { %2758 = vmatpush3.msra.mxu1 %v2238_v44 }
 0x4b4   : > { %2759 = vmatprep.subr.mxu1 %v2879_v15 }
 0x4b5   : > { %2760 = vmatpush3.msra.mxu1 %v2237_v45 }
 0x4b6   : > { %2761 = vmatprep.subr.mxu1 %v2879_v15 }
 0x4b7   : > { %2762 = vmatpush3.msra.mxu1 %v2236_v46 }
 0x4b8   : > { %2763 = vmatprep.subr.mxu1 %v2879_v15 }
 0x4b9   : > { %2764 = vmatpush3.msra.mxu1 %v2235_v47 }
 0x4ba   : > { %2765 = vmatprep.subr.mxu1 %v2879_v15 }
 0x4bb   : > { %2766 = vmatpush3.msra.mxu1 %v2234_v29 }
 0x558   : > { %v2006_v24 = vpop.f32.mrf.mxu1 }
 0x559   : > { %v2010_v52 = vadd.f32 %v2006_v24, %v1935_v51 }
 0x55a   : > { %v2683_v30 = vpop.f32.mrf.mxu1  ;;  %v2080_v49 = vpop.f32.mrf.mxu0 }
 0x55b   : > { %v2084_v53 = vadd.f32 %v2080_v49, %v2010_v52 }
 0x55c   : > { %v2706_v50 = vpop.f32.mrf.mxu0 }
 0x56c   : > { %v2154_v54 = vpop.f32.mrf.mxu1 }
 0x56d   : > { %v2158_v55 = vadd.f32 %v2154_v54, %v2084_v53 }
 0x56e   : > { %v2729_v56 = vpop.f32.mrf.mxu1  ;;  %v2228_v57 = vpop.f32.mrf.mxu0 }
 0x56f   : > { %v2232_v15 = vadd.f32 %v2228_v57, %v2158_v55 }
 0x570   : > { %v2752_v58 = vpop.f32.mrf.mxu0 }
 0x571   : > { %v2233_v59 = vmax.f32 %v2232_v15, 0.0 }
 0x573   : > { %2768 = vmatmul.mubr.msk.f32.vlgmr.msra.gmra.mxu1 %vm2242_vm12, %v2233_v59 }
 0x633   : > { %v2316_v61 = vpop.f32.mrf.mxu1 }
 0x634   : > { %v2317_v62 = vadd.f32 %v2316_v61, %v2241_v60 }
 0x635   : > { %v2769_v63 = vpop.f32.mrf.mxu1 }
 0x636   : > { %v2321_v0 = vsel %vm2320_vm13, %v2317_v62, -inf }
 0x637   : > { %2322 = vmax.xlane.f32.xlu0 %v2321_v0 }
 0x6c0   : > { %v2323_v1 = vpop.xlane.xlu0 %2322 }
 0x6c1   : > { %v2324_v2 = vsub.f32 %v2317_v62, %v2323_v1 }
 0x6c3   : > { %v2325_v3 = vmul.f32 1.442695, %v2324_v2 }
 0x6c5   : > { %2813 = vpow2.f32 %v2325_v3 }
 0x6d2   : > { %v2814_v4 = vpop.eup %2813 }
 0x6d3   : > { %v2327_v5 = vsel %vm2320_vm13, %v2814_v4, 0.0 }
 0x6d4   : > { %2328 = vadd.xlane.f32.xlu1 %v2327_v5 }
 0x75d   : > { %v2329_v6 = vpop.xlane.xlu1 %2328 }
 0x75e   : > { %2815 = vlog2.f32 %v2329_v6 }
 0x76b   : > { %v2816_v7 = vpop.eup %2815 }
 0x76c   : > { %v2331_v8 = vmul.f32 0.6931472, %v2816_v7 }
 0x76e   : > { %v2332_v9 = vsub.f32 %v2324_v2, %v2331_v8 }
 0x770   : > { %2333 = vst.msk [vmem:[%s378_s25] sm:$0x1] %vm2320_vm13, %v2332_v9 }
 0x771   : > { %2830 = shalt.err (!%p2827_p3)
}
 0x772   : > { %s2831_s30 = scalar_lea.hbm %s2345_s13, 16  ;;  %s2835_s25 = scalar_lea.hbm %s3985_s11, 32 }
 0x773   : > { %p2832_p4 = scmp.ne.s32.totalorder %s2345_s13, %s2831_s30  ;;  %p2836_p9 = scmp.lt.s32.totalorder %s2345_s13, %s3985_s11 }
 0x774   : > { %p2837_p10 = scmp.lt.s32.totalorder %s2835_s25, %s2831_s30 }
 0x775   : > { %p2833_p7 = pnand %p2832_p4, %p2982_p5 }
 0x776   : > { %p2838_p11 = por %p2837_p10, %p2836_p9 }
 0x777   : > { %p2834_p8 = pneg %p2833_p7 }
 0x779   : > { %p2839_p12 = pnand %p2838_p11, %p2834_p8 }
 0x77b   : > { %2842 = shalt.err (!%p2839_p12)
}
 0x77c   : > { %2770 = dma.vmem_to_hbm [thread:$0]  (%p2982_p5), %s2348_s29, 16, %s2345_s13, %s2335_s16  }
 0x77d PF: > { %p2776_p13 = scmp.ge.s32.totalorder %s2877_s20, 2  ;;  %s2359_s22 = sand.u32 1, %s2865_s17  }
 0x77e   : > { %s2360_s24 = scalar_lea.sflag [#allocation3], %s2359_s22 }
 0x77f   : > { %p2773_p0 = pnand %p2776_p13, %p2986_p6 }
 0x781   : > { %p2774_p1 = pneg %p2773_p0 }
 0x783   : > { %2860 = dma.done.wait (%p2774_p1), %s2360_s24, 16  }
 0x784   : > { %2862 = vsyncadd (%p2774_p1), %s2360_s24, 4294967280  ;;  %s3991_s0 = sld [smem:[#allocation5_spill]]  ;;  %p21_p2 = scmp.ge.s32.totalorder %s2969_s23, 4  }
 0x785   : > { %s3992_s17 = smov %s2869_s18  ;;  %s3993_s18 = smov %s2873_s19 }
 0x786   : > { %s3995_s20 = smov %s2969_s23  ;;  %23 = sbr.rel (!%p21_p2) target bundleno = 5 (0x5), region = 109 }
 0x78a   : > { %s3994_s19 = smov %s3991_s0 }
 0x78b   :  { %2364 = vsyncpa [#allocation3], 1 }
 0x78c   :  { %2366 = vsyncpa [#allocation3 + $0x1], 1 }

</bundles_post_ra>
